<compile_context>
chip_gen: v7x
topology: tpu7x:2x2x1
jax: 0.10.0
libtpu: 0.0.40
codegen_flags: <defaults>
</compile_context>

<pallas_src>
import jax
import jax.numpy as jnp
from jax.experimental import pallas as pl
from jax.experimental.pallas import tpu as pltpu

VOCAB = 100
VOCAB_PAD = 128   # lane-aligned vocab for the one-hot gather matmul
D = 32            # embedding dim / LSTM input size
H = 64            # LSTM hidden size
HP = 128          # lane-padded hidden size (one 128-lane tile per gate)
F1 = 32           # fc1 out
F2 = 10           # fc2 out
LANES = 4 * HP    # 512 slab lanes

# --- row layout of the packed parameter slab (all starts are multiples of 8) ---
R_WF = 0                       # W_fused = emb_pad @ W_ih_pad        rows [  0,128)
R_WHH = R_WF + VOCAB_PAD       # W_hh_pad                            rows [128,256)
R_BIAS = R_WHH + HP            # lstm bias (b_ih + b_hh), 1 row      row   256
R_B1 = R_BIAS + 8              # fc1 bias, cols [0,32)               row   264
R_B2 = R_B1 + 8                # fc2 bias, cols [0,10)               row   272
R_W1 = R_B2 + 8                # fc1 weight (HP x F1)                rows [280,408)
R_W2 = R_W1 + HP               # fc2 weight (F1 x F2)                rows [408,440)
SLAB_ROWS = R_W2 + F1          # 440 rows x 512 lanes x f32 ~= 0.86 MiB


def fused_forward_kernel(ids_ref, slab_ref, out_ref):
    B = out_ref.shape[0]
    TB = ids_ref.shape[0]
    T = TB // B
    Vp = VOCAB_PAD
    Hp = HP

    # --- fused embedding gather + input projection (W_fused precomputed) ---
    ids = ids_ref[...]                                                # (T*B, 1) int32
    lane_iota = jax.lax.broadcasted_iota(jnp.int32, (TB, Vp), 1)
    onehot = jnp.where(lane_iota == ids, 1.0, 0.0).astype(jnp.float32)
    bias = slab_ref[R_BIAS:R_BIAS + 1, :]                             # (1, 4*Hp)
    gates_x = jnp.dot(onehot, slab_ref[R_WF:R_WF + Vp, :],
                      preferred_element_type=jnp.float32) + bias      # (T*B, 4*Hp)

    # --- LSTM recurrence: fully unrolled, h/c live in vregs ---
    h = jnp.zeros((B, Hp), jnp.float32)
    c = jnp.zeros((B, Hp), jnp.float32)
    for t in range(T):  # T is small & static -> full unroll, constant indices
        # W_hh is re-read from VMEM inside the step (not hoisted): keeps the
        # 256 KB weight out of the vreg file across the unroll.
        g = gates_x[t * B:(t + 1) * B, :] + jnp.dot(
            h, slab_ref[R_WHH:R_WHH + Hp, :],
            preferred_element_type=jnp.float32)                       # (B, 4*Hp)
        # gate slices are 128-lane aligned; sigmoid via single-EUP tanh form
        i_g = 0.5 * jnp.tanh(0.5 * g[:, 0 * Hp:1 * Hp]) + 0.5
        f_g = 0.5 * jnp.tanh(0.5 * g[:, 1 * Hp:2 * Hp]) + 0.5
        g_g = jnp.tanh(g[:, 2 * Hp:3 * Hp])
        o_g = 0.5 * jnp.tanh(0.5 * g[:, 3 * Hp:4 * Hp]) + 0.5
        c = f_g * c + i_g * g_g
        h = o_g * jnp.tanh(c)

    # --- head: fc1 + ReLU, fc2 ---
    w1 = slab_ref[R_W1:R_W1 + Hp, 0:F1]                               # (Hp, F1)
    b1 = slab_ref[R_B1:R_B1 + 1, 0:F1]                                # (1, F1)
    w2 = slab_ref[R_W2:R_W2 + F1, 0:F2]                               # (F1, F2)
    b2 = slab_ref[R_B2:R_B2 + 1, 0:F2]                                # (1, F2)
    z1 = jnp.maximum(
        jnp.dot(h, w1, preferred_element_type=jnp.float32) + b1, 0.0)  # (B, F1)
    out_ref[...] = jnp.dot(z1, w2, preferred_element_type=jnp.float32) + b2


def _pad_gate_cols(w):
    """(rows, 4H) -> (rows, 4*HP); gate g's H columns land at [g*HP, g*HP+H)."""
    rows = w.shape[0]
    out = jnp.zeros((rows, 4 * HP), jnp.float32)
    for g in range(4):
        out = out.at[:, g * HP:g * HP + H].set(w[:, g * H:(g + 1) * H])
    return out


def prepare_params(params):
    """One-time packing of all weights into a single lane-aligned f32 slab.

    Call ONCE at init (not per forward): fuses emb @ W_ih^T, pads gates to
    128-lane tiles and concatenates everything into a (SLAB_ROWS, 512) slab.
    """
    emb_p = jnp.zeros((VOCAB_PAD, D), jnp.float32).at[:VOCAB].set(params["embedding"])
    wih_p = _pad_gate_cols(params["w_ih"].T)                              # (D, 4*HP)
    w_fused = emb_p @ wih_p                                               # (Vp, 4*HP)
    whh_p = jnp.zeros((HP, 4 * HP), jnp.float32).at[:H].set(
        _pad_gate_cols(params["w_hh"].T))                                 # (HP, 4*HP)
    bias_p = _pad_gate_cols((params["b_ih"] + params["b_hh"]).reshape(1, 4 * H))
    w1_p = jnp.zeros((HP, F1), jnp.float32).at[:H].set(params["fc1_w"].T)  # (HP, F1)

    slab = jnp.zeros((SLAB_ROWS, LANES), jnp.float32)
    slab = slab.at[R_WF:R_WF + VOCAB_PAD, :].set(w_fused)
    slab = slab.at[R_WHH:R_WHH + HP, :].set(whh_p)
    slab = slab.at[R_BIAS, :].set(bias_p[0])
    slab = slab.at[R_B1, :F1].set(params["fc1_b"])
    slab = slab.at[R_B2, :F2].set(params["fc2_b"])
    slab = slab.at[R_W1:R_W1 + HP, :F1].set(w1_p)
    slab = slab.at[R_W2:R_W2 + F1, :F2].set(params["fc2_w"].T)
    return slab


def simple_test_model_forward(token_ids, slab):
    """token_ids: (B, T) int32, slab: prepare_params output -> logits (B, 10)."""
    B, T = token_ids.shape
    # Time-major flat id column: row t*B + b == token_ids[b, t] (tiny fused op).
    ids_col = token_ids.T.reshape(T * B, 1).astype(jnp.int32)

    vmem = pl.BlockSpec(memory_space=pltpu.MemorySpace.VMEM)
    return pl.pallas_call(
        fused_forward_kernel,
        out_shape=jax.ShapeDtypeStruct((B, F2), jnp.float32),
        in_specs=[vmem, vmem],
        out_specs=vmem,
    )(ids_col, slab)


def init_params(key):
    """Deterministic parameter init matching the PyTorch module's shapes."""
    ks = jax.random.split(key, 9)
    u = lambda k, shape, s: jax.random.uniform(k, shape, jnp.float32, -s, s)
    s_lstm = 1.0 / jnp.sqrt(H)
    s_fc1 = 1.0 / jnp.sqrt(H)
    s_fc2 = 1.0 / jnp.sqrt(F1)
    return {
        "embedding": jax.random.normal(ks[0], (VOCAB, D), jnp.float32),
        "w_ih": u(ks[1], (4 * H, D), s_lstm),
        "w_hh": u(ks[2], (4 * H, H), s_lstm),
        "b_ih": u(ks[3], (4 * H,), s_lstm),
        "b_hh": u(ks[4], (4 * H,), s_lstm),
        "fc1_w": u(ks[5], (F1, H), s_fc1),
        "fc1_b": u(ks[6], (F1,), s_fc1),
        "fc2_w": u(ks[7], (F2, F1), s_fc2),
        "fc2_b": u(ks[8], (F2,), s_fc2),
    }


def _reference_forward(token_ids, params):
    """Pure-JAX reference (same math) for a sanity check."""
    emb = jnp.take(params["embedding"], token_ids, axis=0)
    B = token_ids.shape[0]
    h = jnp.zeros((B, H), jnp.float32)
    c = jnp.zeros((B, H), jnp.float32)
    w_ih_t, w_hh_t = params["w_ih"].T, params["w_hh"].T
    bias = params["b_ih"] + params["b_hh"]
    for t in range(token_ids.shape[1]):
        g = emb[:, t, :] @ w_ih_t + h @ w_hh_t + bias
        i = jax.nn.sigmoid(g[:, 0 * H:1 * H])
        f = jax.nn.sigmoid(g[:, 1 * H:2 * H])
        gg = jnp.tanh(g[:, 2 * H:3 * H])
        o = jax.nn.sigmoid(g[:, 3 * H:4 * H])
        c = f * c + i * gg
        h = o * jnp.tanh(c)
    z = jnp.maximum(h @ params["fc1_w"].T + params["fc1_b"], 0.0)
    return z @ params["fc2_w"].T + params["fc2_b"]


if __name__ == "__main__":
    key = jax.random.PRNGKey(0)
    k_param, k_tok = jax.random.split(key)
    params = init_params(k_param)

    # One-time parameter packing (NOT inside the per-call forward).
    slab = jax.block_until_ready(prepare_params(params))

    B, T = 2, 8
    token_ids = jax.random.randint(k_tok, (B, T), 0, VOCAB, dtype=jnp.int32)

    forward = jax.jit(simple_test_model_forward)
    out = forward(token_ids, slab)
    out = jax.block_until_ready(out)

    ref = _reference_forward(token_ids, params)
    assert out.shape == (B, F2)
    assert jnp.allclose(out, ref, atol=1e-4, rtol=1e-4), "mismatch vs reference"
    print("KERNEL_OK")
</pallas_src>

<mosaic_0001>
module attributes {stable_mosaic.version = 11 : i64} {
  func.func @fused_forward_kernel(%arg0: memref<16x1xi32, #tpu.memory_space<vmem>>, %arg1: memref<440x512xf32, #tpu.memory_space<vmem>>, %arg2: memref<2x10xf32, #tpu.memory_space<vmem>>) attributes {dimension_semantics = [], scalar_prefetch = 0 : i64, scratch_operands = 0 : i64, tpu.core_type = #tpu.core_type<tc>} {
    %c0 = arith.constant 0 : index
    %c0_0 = arith.constant 0 : index
    %0 = vector.load %arg0[%c0, %c0_0] : memref<16x1xi32, #tpu.memory_space<vmem>>, vector<16x1xi32>
    %1 = tpu.iota {dimensions = array<i32: 1>} : vector<16x128xi32>
    %2 = vector.broadcast %0 : vector<16x1xi32> to vector<16x128xi32>
    %3 = arith.cmpi eq, %1, %2 : vector<16x128xi32>
    %cst = arith.constant 1.000000e+00 : f32
    %cst_1 = arith.constant 0.000000e+00 : f32
    %4 = vector.broadcast %cst : f32 to vector<16x128xf32>
    %5 = vector.broadcast %cst_1 : f32 to vector<16x128xf32>
    %6 = arith.select %3, %4, %5 : vector<16x128xi1>, vector<16x128xf32>
    %c256 = arith.constant 256 : index
    %c0_2 = arith.constant 0 : index
    %7 = vector.load %arg1[%c256, %c0_2] : memref<440x512xf32, #tpu.memory_space<vmem>>, vector<1x512xf32>
    %c0_3 = arith.constant 0 : index
    %c0_4 = arith.constant 0 : index
    %8 = vector.load %arg1[%c0_3, %c0_4] : memref<440x512xf32, #tpu.memory_space<vmem>>, vector<128x512xf32>
    %cst_5 = arith.constant dense<0.000000e+00> : vector<16x512xf32>
    %9 = tpu.matmul %6, %8, %cst_5 {dimension_numbers = #tpu.dot_dimension_numbers<[1], [0], [0], [1], [0, 0, 1, 1], [], []>} : vector<16x128xf32>, vector<128x512xf32>, vector<16x512xf32> -> vector<16x512xf32>
    %10 = vector.broadcast %7 : vector<1x512xf32> to vector<16x512xf32>
    %11 = arith.addf %9, %10 : vector<16x512xf32>
    %cst_6 = arith.constant 0.000000e+00 : f32
    %12 = vector.broadcast %cst_6 : f32 to vector<2x128xf32>
    %cst_7 = arith.constant 0.000000e+00 : f32
    %13 = vector.broadcast %cst_7 : f32 to vector<2x128xf32>
    %14 = vector.extract_strided_slice %11 {offsets = [0, 0], sizes = [2, 512], strides = [1, 1]} : vector<16x512xf32> to vector<2x512xf32>
    %c128 = arith.constant 128 : index
    %c0_8 = arith.constant 0 : index
    %15 = vector.load %arg1[%c128, %c0_8] : memref<440x512xf32, #tpu.memory_space<vmem>>, vector<128x512xf32>
    %cst_9 = arith.constant dense<0.000000e+00> : vector<2x512xf32>
    %16 = tpu.matmul %12, %15, %cst_9 {dimension_numbers = #tpu.dot_dimension_numbers<[1], [0], [0], [1], [0, 0, 1, 1], [], []>} : vector<2x128xf32>, vector<128x512xf32>, vector<2x512xf32> -> vector<2x512xf32>
    %17 = arith.addf %14, %16 : vector<2x512xf32>
    %18 = vector.extract_strided_slice %17 {offsets = [0, 0], sizes = [2, 128], strides = [1, 1]} : vector<2x512xf32> to vector<2x128xf32>
    %cst_10 = arith.constant 5.000000e-01 : f32
    %19 = vector.broadcast %cst_10 : f32 to vector<2x128xf32>
    %20 = arith.mulf %19, %18 : vector<2x128xf32>
    %21 = math.tanh %20 : vector<2x128xf32>
    %cst_11 = arith.constant 5.000000e-01 : f32
    %22 = vector.broadcast %cst_11 : f32 to vector<2x128xf32>
    %23 = arith.mulf %22, %21 : vector<2x128xf32>
    %cst_12 = arith.constant 5.000000e-01 : f32
    %24 = vector.broadcast %cst_12 : f32 to vector<2x128xf32>
    %25 = arith.addf %23, %24 : vector<2x128xf32>
    %26 = vector.extract_strided_slice %17 {offsets = [0, 128], sizes = [2, 128], strides = [1, 1]} : vector<2x512xf32> to vector<2x128xf32>
    %cst_13 = arith.constant 5.000000e-01 : f32
    %27 = vector.broadcast %cst_13 : f32 to vector<2x128xf32>
    %28 = arith.mulf %27, %26 : vector<2x128xf32>
    %29 = math.tanh %28 : vector<2x128xf32>
    %cst_14 = arith.constant 5.000000e-01 : f32
    %30 = vector.broadcast %cst_14 : f32 to vector<2x128xf32>
    %31 = arith.mulf %30, %29 : vector<2x128xf32>
    %cst_15 = arith.constant 5.000000e-01 : f32
    %32 = vector.broadcast %cst_15 : f32 to vector<2x128xf32>
    %33 = arith.addf %31, %32 : vector<2x128xf32>
    %34 = vector.extract_strided_slice %17 {offsets = [0, 256], sizes = [2, 128], strides = [1, 1]} : vector<2x512xf32> to vector<2x128xf32>
    %35 = math.tanh %34 : vector<2x128xf32>
    %36 = vector.extract_strided_slice %17 {offsets = [0, 384], sizes = [2, 128], strides = [1, 1]} : vector<2x512xf32> to vector<2x128xf32>
    %cst_16 = arith.constant 5.000000e-01 : f32
    %37 = vector.broadcast %cst_16 : f32 to vector<2x128xf32>
    %38 = arith.mulf %37, %36 : vector<2x128xf32>
    %39 = math.tanh %38 : vector<2x128xf32>
    %cst_17 = arith.constant 5.000000e-01 : f32
    %40 = vector.broadcast %cst_17 : f32 to vector<2x128xf32>
    %41 = arith.mulf %40, %39 : vector<2x128xf32>
    %cst_18 = arith.constant 5.000000e-01 : f32
    %42 = vector.broadcast %cst_18 : f32 to vector<2x128xf32>
    %43 = arith.addf %41, %42 : vector<2x128xf32>
    %44 = arith.mulf %33, %13 : vector<2x128xf32>
    %45 = arith.mulf %25, %35 : vector<2x128xf32>
    %46 = arith.addf %44, %45 : vector<2x128xf32>
    %47 = math.tanh %46 : vector<2x128xf32>
    %48 = arith.mulf %43, %47 : vector<2x128xf32>
    %49 = vector.extract_strided_slice %11 {offsets = [2, 0], sizes = [2, 512], strides = [1, 1]} : vector<16x512xf32> to vector<2x512xf32>
    %c128_19 = arith.constant 128 : index
    %c0_20 = arith.constant 0 : index
    %50 = vector.load %arg1[%c128_19, %c0_20] : memref<440x512xf32, #tpu.memory_space<vmem>>, vector<128x512xf32>
    %cst_21 = arith.constant dense<0.000000e+00> : vector<2x512xf32>
    %51 = tpu.matmul %48, %50, %cst_21 {dimension_numbers = #tpu.dot_dimension_numbers<[1], [0], [0], [1], [0, 0, 1, 1], [], []>} : vector<2x128xf32>, vector<128x512xf32>, vector<2x512xf32> -> vector<2x512xf32>
    %52 = arith.addf %49, %51 : vector<2x512xf32>
    %53 = vector.extract_strided_slice %52 {offsets = [0, 0], sizes = [2, 128], strides = [1, 1]} : vector<2x512xf32> to vector<2x128xf32>
    %cst_22 = arith.constant 5.000000e-01 : f32
    %54 = vector.broadcast %cst_22 : f32 to vector<2x128xf32>
    %55 = arith.mulf %54, %53 : vector<2x128xf32>
    %56 = math.tanh %55 : vector<2x128xf32>
    %cst_23 = arith.constant 5.000000e-01 : f32
    %57 = vector.broadcast %cst_23 : f32 to vector<2x128xf32>
    %58 = arith.mulf %57, %56 : vector<2x128xf32>
    %cst_24 = arith.constant 5.000000e-01 : f32
    %59 = vector.broadcast %cst_24 : f32 to vector<2x128xf32>
    %60 = arith.addf %58, %59 : vector<2x128xf32>
    %61 = vector.extract_strided_slice %52 {offsets = [0, 128], sizes = [2, 128], strides = [1, 1]} : vector<2x512xf32> to vector<2x128xf32>
    %cst_25 = arith.constant 5.000000e-01 : f32
    %62 = vector.broadcast %cst_25 : f32 to vector<2x128xf32>
    %63 = arith.mulf %62, %61 : vector<2x128xf32>
    %64 = math.tanh %63 : vector<2x128xf32>
    %cst_26 = arith.constant 5.000000e-01 : f32
    %65 = vector.broadcast %cst_26 : f32 to vector<2x128xf32>
    %66 = arith.mulf %65, %64 : vector<2x128xf32>
    %cst_27 = arith.constant 5.000000e-01 : f32
    %67 = vector.broadcast %cst_27 : f32 to vector<2x128xf32>
    %68 = arith.addf %66, %67 : vector<2x128xf32>
    %69 = vector.extract_strided_slice %52 {offsets = [0, 256], sizes = [2, 128], strides = [1, 1]} : vector<2x512xf32> to vector<2x128xf32>
    %70 = math.tanh %69 : vector<2x128xf32>
    %71 = vector.extract_strided_slice %52 {offsets = [0, 384], sizes = [2, 128], strides = [1, 1]} : vector<2x512xf32> to vector<2x128xf32>
    %cst_28 = arith.constant 5.000000e-01 : f32
    %72 = vector.broadcast %cst_28 : f32 to vector<2x128xf32>
    %73 = arith.mulf %72, %71 : vector<2x128xf32>
    %74 = math.tanh %73 : vector<2x128xf32>
    %cst_29 = arith.constant 5.000000e-01 : f32
    %75 = vector.broadcast %cst_29 : f32 to vector<2x128xf32>
    %76 = arith.mulf %75, %74 : vector<2x128xf32>
    %cst_30 = arith.constant 5.000000e-01 : f32
    %77 = vector.broadcast %cst_30 : f32 to vector<2x128xf32>
    %78 = arith.addf %76, %77 : vector<2x128xf32>
    %79 = arith.mulf %68, %46 : vector<2x128xf32>
    %80 = arith.mulf %60, %70 : vector<2x128xf32>
    %81 = arith.addf %79, %80 : vector<2x128xf32>
    %82 = math.tanh %81 : vector<2x128xf32>
    %83 = arith.mulf %78, %82 : vector<2x128xf32>
    %84 = vector.extract_strided_slice %11 {offsets = [4, 0], sizes = [2, 512], strides = [1, 1]} : vector<16x512xf32> to vector<2x512xf32>
    %c128_31 = arith.constant 128 : index
    %c0_32 = arith.constant 0 : index
    %85 = vector.load %arg1[%c128_31, %c0_32] : memref<440x512xf32, #tpu.memory_space<vmem>>, vector<128x512xf32>
    %cst_33 = arith.constant dense<0.000000e+00> : vector<2x512xf32>
    %86 = tpu.matmul %83, %85, %cst_33 {dimension_numbers = #tpu.dot_dimension_numbers<[1], [0], [0], [1], [0, 0, 1, 1], [], []>} : vector<2x128xf32>, vector<128x512xf32>, vector<2x512xf32> -> vector<2x512xf32>
    %87 = arith.addf %84, %86 : vector<2x512xf32>
    %88 = vector.extract_strided_slice %87 {offsets = [0, 0], sizes = [2, 128], strides = [1, 1]} : vector<2x512xf32> to vector<2x128xf32>
    %cst_34 = arith.constant 5.000000e-01 : f32
    %89 = vector.broadcast %cst_34 : f32 to vector<2x128xf32>
    %90 = arith.mulf %89, %88 : vector<2x128xf32>
    %91 = math.tanh %90 : vector<2x128xf32>
    %cst_35 = arith.constant 5.000000e-01 : f32
    %92 = vector.broadcast %cst_35 : f32 to vector<2x128xf32>
    %93 = arith.mulf %92, %91 : vector<2x128xf32>
    %cst_36 = arith.constant 5.000000e-01 : f32
    %94 = vector.broadcast %cst_36 : f32 to vector<2x128xf32>
    %95 = arith.addf %93, %94 : vector<2x128xf32>
    %96 = vector.extract_strided_slice %87 {offsets = [0, 128], sizes = [2, 128], strides = [1, 1]} : vector<2x512xf32> to vector<2x128xf32>
    %cst_37 = arith.constant 5.000000e-01 : f32
    %97 = vector.broadcast %cst_37 : f32 to vector<2x128xf32>
    %98 = arith.mulf %97, %96 : vector<2x128xf32>
    %99 = math.tanh %98 : vector<2x128xf32>
    %cst_38 = arith.constant 5.000000e-01 : f32
    %100 = vector.broadcast %cst_38 : f32 to vector<2x128xf32>
    %101 = arith.mulf %100, %99 : vector<2x128xf32>
    %cst_39 = arith.constant 5.000000e-01 : f32
    %102 = vector.broadcast %cst_39 : f32 to vector<2x128xf32>
    %103 = arith.addf %101, %102 : vector<2x128xf32>
    %104 = vector.extract_strided_slice %87 {offsets = [0, 256], sizes = [2, 128], strides = [1, 1]} : vector<2x512xf32> to vector<2x128xf32>
    %105 = math.tanh %104 : vector<2x128xf32>
    %106 = vector.extract_strided_slice %87 {offsets = [0, 384], sizes = [2, 128], strides = [1, 1]} : vector<2x512xf32> to vector<2x128xf32>
    %cst_40 = arith.constant 5.000000e-01 : f32
    %107 = vector.broadcast %cst_40 : f32 to vector<2x128xf32>
    %108 = arith.mulf %107, %106 : vector<2x128xf32>
    %109 = math.tanh %108 : vector<2x128xf32>
    %cst_41 = arith.constant 5.000000e-01 : f32
    %110 = vector.broadcast %cst_41 : f32 to vector<2x128xf32>
    %111 = arith.mulf %110, %109 : vector<2x128xf32>
    %cst_42 = arith.constant 5.000000e-01 : f32
    %112 = vector.broadcast %cst_42 : f32 to vector<2x128xf32>
    %113 = arith.addf %111, %112 : vector<2x128xf32>
    %114 = arith.mulf %103, %81 : vector<2x128xf32>
    %115 = arith.mulf %95, %105 : vector<2x128xf32>
    %116 = arith.addf %114, %115 : vector<2x128xf32>
    %117 = math.tanh %116 : vector<2x128xf32>
    %118 = arith.mulf %113, %117 : vector<2x128xf32>
    %119 = vector.extract_strided_slice %11 {offsets = [6, 0], sizes = [2, 512], strides = [1, 1]} : vector<16x512xf32> to vector<2x512xf32>
    %c128_43 = arith.constant 128 : index
    %c0_44 = arith.constant 0 : index
    %120 = vector.load %arg1[%c128_43, %c0_44] : memref<440x512xf32, #tpu.memory_space<vmem>>, vector<128x512xf32>
    %cst_45 = arith.constant dense<0.000000e+00> : vector<2x512xf32>
    %121 = tpu.matmul %118, %120, %cst_45 {dimension_numbers = #tpu.dot_dimension_numbers<[1], [0], [0], [1], [0, 0, 1, 1], [], []>} : vector<2x128xf32>, vector<128x512xf32>, vector<2x512xf32> -> vector<2x512xf32>
    %122 = arith.addf %119, %121 : vector<2x512xf32>
    %123 = vector.extract_strided_slice %122 {offsets = [0, 0], sizes = [2, 128], strides = [1, 1]} : vector<2x512xf32> to vector<2x128xf32>
    %cst_46 = arith.constant 5.000000e-01 : f32
    %124 = vector.broadcast %cst_46 : f32 to vector<2x128xf32>
    %125 = arith.mulf %124, %123 : vector<2x128xf32>
    %126 = math.tanh %125 : vector<2x128xf32>
    %cst_47 = arith.constant 5.000000e-01 : f32
    %127 = vector.broadcast %cst_47 : f32 to vector<2x128xf32>
    %128 = arith.mulf %127, %126 : vector<2x128xf32>
    %cst_48 = arith.constant 5.000000e-01 : f32
    %129 = vector.broadcast %cst_48 : f32 to vector<2x128xf32>
    %130 = arith.addf %128, %129 : vector<2x128xf32>
    %131 = vector.extract_strided_slice %122 {offsets = [0, 128], sizes = [2, 128], strides = [1, 1]} : vector<2x512xf32> to vector<2x128xf32>
    %cst_49 = arith.constant 5.000000e-01 : f32
    %132 = vector.broadcast %cst_49 : f32 to vector<2x128xf32>
    %133 = arith.mulf %132, %131 : vector<2x128xf32>
    %134 = math.tanh %133 : vector<2x128xf32>
    %cst_50 = arith.constant 5.000000e-01 : f32
    %135 = vector.broadcast %cst_50 : f32 to vector<2x128xf32>
    %136 = arith.mulf %135, %134 : vector<2x128xf32>
    %cst_51 = arith.constant 5.000000e-01 : f32
    %137 = vector.broadcast %cst_51 : f32 to vector<2x128xf32>
    %138 = arith.addf %136, %137 : vector<2x128xf32>
    %139 = vector.extract_strided_slice %122 {offsets = [0, 256], sizes = [2, 128], strides = [1, 1]} : vector<2x512xf32> to vector<2x128xf32>
    %140 = math.tanh %139 : vector<2x128xf32>
    %141 = vector.extract_strided_slice %122 {offsets = [0, 384], sizes = [2, 128], strides = [1, 1]} : vector<2x512xf32> to vector<2x128xf32>
    %cst_52 = arith.constant 5.000000e-01 : f32
    %142 = vector.broadcast %cst_52 : f32 to vector<2x128xf32>
    %143 = arith.mulf %142, %141 : vector<2x128xf32>
    %144 = math.tanh %143 : vector<2x128xf32>
    %cst_53 = arith.constant 5.000000e-01 : f32
    %145 = vector.broadcast %cst_53 : f32 to vector<2x128xf32>
    %146 = arith.mulf %145, %144 : vector<2x128xf32>
    %cst_54 = arith.constant 5.000000e-01 : f32
    %147 = vector.broadcast %cst_54 : f32 to vector<2x128xf32>
    %148 = arith.addf %146, %147 : vector<2x128xf32>
    %149 = arith.mulf %138, %116 : vector<2x128xf32>
    %150 = arith.mulf %130, %140 : vector<2x128xf32>
    %151 = arith.addf %149, %150 : vector<2x128xf32>
    %152 = math.tanh %151 : vector<2x128xf32>
    %153 = arith.mulf %148, %152 : vector<2x128xf32>
    %154 = vector.extract_strided_slice %11 {offsets = [8, 0], sizes = [2, 512], strides = [1, 1]} : vector<16x512xf32> to vector<2x512xf32>
    %c128_55 = arith.constant 128 : index
    %c0_56 = arith.constant 0 : index
    %155 = vector.load %arg1[%c128_55, %c0_56] : memref<440x512xf32, #tpu.memory_space<vmem>>, vector<128x512xf32>
    %cst_57 = arith.constant dense<0.000000e+00> : vector<2x512xf32>
    %156 = tpu.matmul %153, %155, %cst_57 {dimension_numbers = #tpu.dot_dimension_numbers<[1], [0], [0], [1], [0, 0, 1, 1], [], []>} : vector<2x128xf32>, vector<128x512xf32>, vector<2x512xf32> -> vector<2x512xf32>
    %157 = arith.addf %154, %156 : vector<2x512xf32>
    %158 = vector.extract_strided_slice %157 {offsets = [0, 0], sizes = [2, 128], strides = [1, 1]} : vector<2x512xf32> to vector<2x128xf32>
    %cst_58 = arith.constant 5.000000e-01 : f32
    %159 = vector.broadcast %cst_58 : f32 to vector<2x128xf32>
    %160 = arith.mulf %159, %158 : vector<2x128xf32>
    %161 = math.tanh %160 : vector<2x128xf32>
    %cst_59 = arith.constant 5.000000e-01 : f32
    %162 = vector.broadcast %cst_59 : f32 to vector<2x128xf32>
    %163 = arith.mulf %162, %161 : vector<2x128xf32>
    %cst_60 = arith.constant 5.000000e-01 : f32
    %164 = vector.broadcast %cst_60 : f32 to vector<2x128xf32>
    %165 = arith.addf %163, %164 : vector<2x128xf32>
    %166 = vector.extract_strided_slice %157 {offsets = [0, 128], sizes = [2, 128], strides = [1, 1]} : vector<2x512xf32> to vector<2x128xf32>
    %cst_61 = arith.constant 5.000000e-01 : f32
    %167 = vector.broadcast %cst_61 : f32 to vector<2x128xf32>
    %168 = arith.mulf %167, %166 : vector<2x128xf32>
    %169 = math.tanh %168 : vector<2x128xf32>
    %cst_62 = arith.constant 5.000000e-01 : f32
    %170 = vector.broadcast %cst_62 : f32 to vector<2x128xf32>
    %171 = arith.mulf %170, %169 : vector<2x128xf32>
    %cst_63 = arith.constant 5.000000e-01 : f32
    %172 = vector.broadcast %cst_63 : f32 to vector<2x128xf32>
    %173 = arith.addf %171, %172 : vector<2x128xf32>
    %174 = vector.extract_strided_slice %157 {offsets = [0, 256], sizes = [2, 128], strides = [1, 1]} : vector<2x512xf32> to vector<2x128xf32>
    %175 = math.tanh %174 : vector<2x128xf32>
    %176 = vector.extract_strided_slice %157 {offsets = [0, 384], sizes = [2, 128], strides = [1, 1]} : vector<2x512xf32> to vector<2x128xf32>
    %cst_64 = arith.constant 5.000000e-01 : f32
    %177 = vector.broadcast %cst_64 : f32 to vector<2x128xf32>
    %178 = arith.mulf %177, %176 : vector<2x128xf32>
    %179 = math.tanh %178 : vector<2x128xf32>
    %cst_65 = arith.constant 5.000000e-01 : f32
    %180 = vector.broadcast %cst_65 : f32 to vector<2x128xf32>
    %181 = arith.mulf %180, %179 : vector<2x128xf32>
    %cst_66 = arith.constant 5.000000e-01 : f32
    %182 = vector.broadcast %cst_66 : f32 to vector<2x128xf32>
    %183 = arith.addf %181, %182 : vector<2x128xf32>
    %184 = arith.mulf %173, %151 : vector<2x128xf32>
    %185 = arith.mulf %165, %175 : vector<2x128xf32>
    %186 = arith.addf %184, %185 : vector<2x128xf32>
    %187 = math.tanh %186 : vector<2x128xf32>
    %188 = arith.mulf %183, %187 : vector<2x128xf32>
    %189 = vector.extract_strided_slice %11 {offsets = [10, 0], sizes = [2, 512], strides = [1, 1]} : vector<16x512xf32> to vector<2x512xf32>
    %c128_67 = arith.constant 128 : index
    %c0_68 = arith.constant 0 : index
    %190 = vector.load %arg1[%c128_67, %c0_68] : memref<440x512xf32, #tpu.memory_space<vmem>>, vector<128x512xf32>
    %cst_69 = arith.constant dense<0.000000e+00> : vector<2x512xf32>
    %191 = tpu.matmul %188, %190, %cst_69 {dimension_numbers = #tpu.dot_dimension_numbers<[1], [0], [0], [1], [0, 0, 1, 1], [], []>} : vector<2x128xf32>, vector<128x512xf32>, vector<2x512xf32> -> vector<2x512xf32>
    %192 = arith.addf %189, %191 : vector<2x512xf32>
    %193 = vector.extract_strided_slice %192 {offsets = [0, 0], sizes = [2, 128], strides = [1, 1]} : vector<2x512xf32> to vector<2x128xf32>
    %cst_70 = arith.constant 5.000000e-01 : f32
    %194 = vector.broadcast %cst_70 : f32 to vector<2x128xf32>
    %195 = arith.mulf %194, %193 : vector<2x128xf32>
    %196 = math.tanh %195 : vector<2x128xf32>
    %cst_71 = arith.constant 5.000000e-01 : f32
    %197 = vector.broadcast %cst_71 : f32 to vector<2x128xf32>
    %198 = arith.mulf %197, %196 : vector<2x128xf32>
    %cst_72 = arith.constant 5.000000e-01 : f32
    %199 = vector.broadcast %cst_72 : f32 to vector<2x128xf32>
    %200 = arith.addf %198, %199 : vector<2x128xf32>
    %201 = vector.extract_strided_slice %192 {offsets = [0, 128], sizes = [2, 128], strides = [1, 1]} : vector<2x512xf32> to vector<2x128xf32>
    %cst_73 = arith.constant 5.000000e-01 : f32
    %202 = vector.broadcast %cst_73 : f32 to vector<2x128xf32>
    %203 = arith.mulf %202, %201 : vector<2x128xf32>
    %204 = math.tanh %203 : vector<2x128xf32>
    %cst_74 = arith.constant 5.000000e-01 : f32
    %205 = vector.broadcast %cst_74 : f32 to vector<2x128xf32>
    %206 = arith.mulf %205, %204 : vector<2x128xf32>
    %cst_75 = arith.constant 5.000000e-01 : f32
    %207 = vector.broadcast %cst_75 : f32 to vector<2x128xf32>
    %208 = arith.addf %206, %207 : vector<2x128xf32>
    %209 = vector.extract_strided_slice %192 {offsets = [0, 256], sizes = [2, 128], strides = [1, 1]} : vector<2x512xf32> to vector<2x128xf32>
    %210 = math.tanh %209 : vector<2x128xf32>
    %211 = vector.extract_strided_slice %192 {offsets = [0, 384], sizes = [2, 128], strides = [1, 1]} : vector<2x512xf32> to vector<2x128xf32>
    %cst_76 = arith.constant 5.000000e-01 : f32
    %212 = vector.broadcast %cst_76 : f32 to vector<2x128xf32>
    %213 = arith.mulf %212, %211 : vector<2x128xf32>
    %214 = math.tanh %213 : vector<2x128xf32>
    %cst_77 = arith.constant 5.000000e-01 : f32
    %215 = vector.broadcast %cst_77 : f32 to vector<2x128xf32>
    %216 = arith.mulf %215, %214 : vector<2x128xf32>
    %cst_78 = arith.constant 5.000000e-01 : f32
    %217 = vector.broadcast %cst_78 : f32 to vector<2x128xf32>
    %218 = arith.addf %216, %217 : vector<2x128xf32>
    %219 = arith.mulf %208, %186 : vector<2x128xf32>
    %220 = arith.mulf %200, %210 : vector<2x128xf32>
    %221 = arith.addf %219, %220 : vector<2x128xf32>
    %222 = math.tanh %221 : vector<2x128xf32>
    %223 = arith.mulf %218, %222 : vector<2x128xf32>
    %224 = vector.extract_strided_slice %11 {offsets = [12, 0], sizes = [2, 512], strides = [1, 1]} : vector<16x512xf32> to vector<2x512xf32>
    %c128_79 = arith.constant 128 : index
    %c0_80 = arith.constant 0 : index
    %225 = vector.load %arg1[%c128_79, %c0_80] : memref<440x512xf32, #tpu.memory_space<vmem>>, vector<128x512xf32>
    %cst_81 = arith.constant dense<0.000000e+00> : vector<2x512xf32>
    %226 = tpu.matmul %223, %225, %cst_81 {dimension_numbers = #tpu.dot_dimension_numbers<[1], [0], [0], [1], [0, 0, 1, 1], [], []>} : vector<2x128xf32>, vector<128x512xf32>, vector<2x512xf32> -> vector<2x512xf32>
    %227 = arith.addf %224, %226 : vector<2x512xf32>
    %228 = vector.extract_strided_slice %227 {offsets = [0, 0], sizes = [2, 128], strides = [1, 1]} : vector<2x512xf32> to vector<2x128xf32>
    %cst_82 = arith.constant 5.000000e-01 : f32
    %229 = vector.broadcast %cst_82 : f32 to vector<2x128xf32>
    %230 = arith.mulf %229, %228 : vector<2x128xf32>
    %231 = math.tanh %230 : vector<2x128xf32>
    %cst_83 = arith.constant 5.000000e-01 : f32
    %232 = vector.broadcast %cst_83 : f32 to vector<2x128xf32>
    %233 = arith.mulf %232, %231 : vector<2x128xf32>
    %cst_84 = arith.constant 5.000000e-01 : f32
    %234 = vector.broadcast %cst_84 : f32 to vector<2x128xf32>
    %235 = arith.addf %233, %234 : vector<2x128xf32>
    %236 = vector.extract_strided_slice %227 {offsets = [0, 128], sizes = [2, 128], strides = [1, 1]} : vector<2x512xf32> to vector<2x128xf32>
    %cst_85 = arith.constant 5.000000e-01 : f32
    %237 = vector.broadcast %cst_85 : f32 to vector<2x128xf32>
    %238 = arith.mulf %237, %236 : vector<2x128xf32>
    %239 = math.tanh %238 : vector<2x128xf32>
    %cst_86 = arith.constant 5.000000e-01 : f32
    %240 = vector.broadcast %cst_86 : f32 to vector<2x128xf32>
    %241 = arith.mulf %240, %239 : vector<2x128xf32>
    %cst_87 = arith.constant 5.000000e-01 : f32
    %242 = vector.broadcast %cst_87 : f32 to vector<2x128xf32>
    %243 = arith.addf %241, %242 : vector<2x128xf32>
    %244 = vector.extract_strided_slice %227 {offsets = [0, 256], sizes = [2, 128], strides = [1, 1]} : vector<2x512xf32> to vector<2x128xf32>
    %245 = math.tanh %244 : vector<2x128xf32>
    %246 = vector.extract_strided_slice %227 {offsets = [0, 384], sizes = [2, 128], strides = [1, 1]} : vector<2x512xf32> to vector<2x128xf32>
    %cst_88 = arith.constant 5.000000e-01 : f32
    %247 = vector.broadcast %cst_88 : f32 to vector<2x128xf32>
    %248 = arith.mulf %247, %246 : vector<2x128xf32>
    %249 = math.tanh %248 : vector<2x128xf32>
    %cst_89 = arith.constant 5.000000e-01 : f32
    %250 = vector.broadcast %cst_89 : f32 to vector<2x128xf32>
    %251 = arith.mulf %250, %249 : vector<2x128xf32>
    %cst_90 = arith.constant 5.000000e-01 : f32
    %252 = vector.broadcast %cst_90 : f32 to vector<2x128xf32>
    %253 = arith.addf %251, %252 : vector<2x128xf32>
    %254 = arith.mulf %243, %221 : vector<2x128xf32>
    %255 = arith.mulf %235, %245 : vector<2x128xf32>
    %256 = arith.addf %254, %255 : vector<2x128xf32>
    %257 = math.tanh %256 : vector<2x128xf32>
    %258 = arith.mulf %253, %257 : vector<2x128xf32>
    %259 = vector.extract_strided_slice %11 {offsets = [14, 0], sizes = [2, 512], strides = [1, 1]} : vector<16x512xf32> to vector<2x512xf32>
    %c128_91 = arith.constant 128 : index
    %c0_92 = arith.constant 0 : index
    %260 = vector.load %arg1[%c128_91, %c0_92] : memref<440x512xf32, #tpu.memory_space<vmem>>, vector<128x512xf32>
    %cst_93 = arith.constant dense<0.000000e+00> : vector<2x512xf32>
    %261 = tpu.matmul %258, %260, %cst_93 {dimension_numbers = #tpu.dot_dimension_numbers<[1], [0], [0], [1], [0, 0, 1, 1], [], []>} : vector<2x128xf32>, vector<128x512xf32>, vector<2x512xf32> -> vector<2x512xf32>
    %262 = arith.addf %259, %261 : vector<2x512xf32>
    %263 = vector.extract_strided_slice %262 {offsets = [0, 0], sizes = [2, 128], strides = [1, 1]} : vector<2x512xf32> to vector<2x128xf32>
    %cst_94 = arith.constant 5.000000e-01 : f32
    %264 = vector.broadcast %cst_94 : f32 to vector<2x128xf32>
    %265 = arith.mulf %264, %263 : vector<2x128xf32>
    %266 = math.tanh %265 : vector<2x128xf32>
    %cst_95 = arith.constant 5.000000e-01 : f32
    %267 = vector.broadcast %cst_95 : f32 to vector<2x128xf32>
    %268 = arith.mulf %267, %266 : vector<2x128xf32>
    %cst_96 = arith.constant 5.000000e-01 : f32
    %269 = vector.broadcast %cst_96 : f32 to vector<2x128xf32>
    %270 = arith.addf %268, %269 : vector<2x128xf32>
    %271 = vector.extract_strided_slice %262 {offsets = [0, 128], sizes = [2, 128], strides = [1, 1]} : vector<2x512xf32> to vector<2x128xf32>
    %cst_97 = arith.constant 5.000000e-01 : f32
    %272 = vector.broadcast %cst_97 : f32 to vector<2x128xf32>
    %273 = arith.mulf %272, %271 : vector<2x128xf32>
    %274 = math.tanh %273 : vector<2x128xf32>
    %cst_98 = arith.constant 5.000000e-01 : f32
    %275 = vector.broadcast %cst_98 : f32 to vector<2x128xf32>
    %276 = arith.mulf %275, %274 : vector<2x128xf32>
    %cst_99 = arith.constant 5.000000e-01 : f32
    %277 = vector.broadcast %cst_99 : f32 to vector<2x128xf32>
    %278 = arith.addf %276, %277 : vector<2x128xf32>
    %279 = vector.extract_strided_slice %262 {offsets = [0, 256], sizes = [2, 128], strides = [1, 1]} : vector<2x512xf32> to vector<2x128xf32>
    %280 = math.tanh %279 : vector<2x128xf32>
    %281 = vector.extract_strided_slice %262 {offsets = [0, 384], sizes = [2, 128], strides = [1, 1]} : vector<2x512xf32> to vector<2x128xf32>
    %cst_100 = arith.constant 5.000000e-01 : f32
    %282 = vector.broadcast %cst_100 : f32 to vector<2x128xf32>
    %283 = arith.mulf %282, %281 : vector<2x128xf32>
    %284 = math.tanh %283 : vector<2x128xf32>
    %cst_101 = arith.constant 5.000000e-01 : f32
    %285 = vector.broadcast %cst_101 : f32 to vector<2x128xf32>
    %286 = arith.mulf %285, %284 : vector<2x128xf32>
    %cst_102 = arith.constant 5.000000e-01 : f32
    %287 = vector.broadcast %cst_102 : f32 to vector<2x128xf32>
    %288 = arith.addf %286, %287 : vector<2x128xf32>
    %289 = arith.mulf %278, %256 : vector<2x128xf32>
    %290 = arith.mulf %270, %280 : vector<2x128xf32>
    %291 = arith.addf %289, %290 : vector<2x128xf32>
    %292 = math.tanh %291 : vector<2x128xf32>
    %293 = arith.mulf %288, %292 : vector<2x128xf32>
    %c280 = arith.constant 280 : index
    %c0_103 = arith.constant 0 : index
    %294 = vector.load %arg1[%c280, %c0_103] : memref<440x512xf32, #tpu.memory_space<vmem>>, vector<128x32xf32>
    %c264 = arith.constant 264 : index
    %c0_104 = arith.constant 0 : index
    %295 = vector.load %arg1[%c264, %c0_104] : memref<440x512xf32, #tpu.memory_space<vmem>>, vector<1x32xf32>
    %c408 = arith.constant 408 : index
    %c0_105 = arith.constant 0 : index
    %296 = vector.load %arg1[%c408, %c0_105] : memref<440x512xf32, #tpu.memory_space<vmem>>, vector<32x10xf32>
    %c272 = arith.constant 272 : index
    %c0_106 = arith.constant 0 : index
    %297 = vector.load %arg1[%c272, %c0_106] : memref<440x512xf32, #tpu.memory_space<vmem>>, vector<1x10xf32>
    %cst_107 = arith.constant dense<0.000000e+00> : vector<2x32xf32>
    %298 = tpu.matmul %293, %294, %cst_107 {dimension_numbers = #tpu.dot_dimension_numbers<[1], [0], [0], [1], [0, 0, 1, 1], [], []>} : vector<2x128xf32>, vector<128x32xf32>, vector<2x32xf32> -> vector<2x32xf32>
    %299 = vector.broadcast %295 : vector<1x32xf32> to vector<2x32xf32>
    %300 = arith.addf %298, %299 : vector<2x32xf32>
    %cst_108 = arith.constant 0.000000e+00 : f32
    %301 = vector.broadcast %cst_108 : f32 to vector<2x32xf32>
    %302 = arith.maximumf %300, %301 : vector<2x32xf32>
    %cst_109 = arith.constant dense<0.000000e+00> : vector<2x10xf32>
    %303 = tpu.matmul %302, %296, %cst_109 {dimension_numbers = #tpu.dot_dimension_numbers<[1], [0], [0], [1], [0, 0, 1, 1], [], []>} : vector<2x32xf32>, vector<32x10xf32>, vector<2x10xf32> -> vector<2x10xf32>
    %304 = vector.broadcast %297 : vector<1x10xf32> to vector<2x10xf32>
    %305 = arith.addf %303, %304 : vector<2x10xf32>
    %c0_110 = arith.constant 0 : index
    %c0_111 = arith.constant 0 : index
    %306 = vector.load %arg2[%c0_110, %c0_111] : memref<2x10xf32, #tpu.memory_space<vmem>>, vector<2x10xf32>
    tpu.vector_store %arg2[%c0_110, %c0_111], %305 {strides = array<i32>} : memref<2x10xf32, #tpu.memory_space<vmem>>, vector<2x10xf32>,
    return
  }
}

</mosaic_0001>

<bundles_post_ra>
// kernel: simple_test_model_forward.1
= control target key start
LH: loop header
LB: loop body
LE: loop exit
PB: predicated region body
PF: predicated region fallthrough
CT: control target
= control target key end

     0   :  { %7 = vsyncpa [#allocation3], 0  ;;  %s3245_s0 = inlined_call_operand.vmem [shape: s32[16,1], index: 0, kind: input, shape index: {}]   ;;  %s3246_s1 = inlined_call_operand.hbm [shape: f32[440,512], index: 1, kind: input, shape index: {}]   ;;  %s3247_s2 = inlined_call_operand.hbm [shape: f32[2,10], index: 2, kind: output, shape index: {}]  }
   0x1   :  { %8 = vsyncpa [#allocation4], 0  ;;  %s2769_s9 = smov [#allocation2]   ;;  %s2721_s13 = scalar_lea.hbm %s3246_s1, 28160 }
   0x2   :  { %s16_s10 = sshll.u32 %s2769_s9, 4  ;;  %p2722_p0 = scmp.ne.s32.totalorder %s3246_s1, %s2721_s13  ;;  %s17_s10 = int_to_ptr.vmem [resolvable:$true] %s16_s10 }
   0x3   :  { %p2725_p1 = scmp.lt.u32.totalorder %s2721_s13, %s3246_s1 }
   0x5   :  { %p2727_p2 = pnand %p2725_p1, %p2722_p0 }
   0x7   :  { %2730 = shalt.err (!%p2727_p2)
}
   0x8   :  { %s2731_s18 = scalar_lea.vmem %s17_s10, 28160  ;;  %p2736_p4 = scmp.lt.s32.totalorder %s17_s10, %s17_s10 }
   0x9   :  { %p2732_p3 = scmp.ne.s32.totalorder %s17_s10, %s2731_s18  ;;  %p2737_p5 = scmp.lt.s32.totalorder %s2731_s18, %s2731_s18 }
   0xb   :  { %p2738_p6 = por %p2737_p5, %p2736_p4 }
   0xd   :  { %p2739_p7 = pnand %p2738_p6, %p2732_p3 }
   0xf   :  { %2742 = shalt.err (!%p2739_p7)
}
  0x10   :  { %s2770_s19 = smov 512   ;;  %s2771_s20 = smov 32  }
  0x11   :  { %22 = dma.hbm_to_vmem [thread:$0]  %s3246_s1, 28160, %s17_s10, [#allocation3], %s2770_s19, %s2770_s19, %s2771_s20  }
  0x12   :  { %2765 = dma.done.wait [#allocation3], 28160  }
  0x13   :  { %2766 = vsyncadd [#allocation3], 4294939136  ;;  %v2772_v0 = vmov 0   ;;  %v26_v1 = vld [vmem:[%s3245_s0] sm:$0xff]  ;;  %v27_v2 = vld [vmem:[%s3245_s0 + $0x8] sm:$0xff]  ;;  %v2773_v7 = vmov 0.0  }
  0x14   :  { %2640 = vset.pattern.permute.xlu0 %v2772_v0  ;;  %v43_v3 = vld [vmem:[#allocation2 + $0x8] sm:$0xff]  ;;  %v45_v5 = vld [vmem:[#allocation2 + $0x18] sm:$0xff]  ;;  %191 = vmatprep.mubr.f32.mxu0 %v2773_v7  ;;  %v42_v10 = vld [vmem:[#allocation2] sm:$0xff]  ;;  %vm2776_vm2 = vmmov 0   ;;  %vm1861_vm3 = vcmask 261120   ;;  %s2777_s0 = smov [#allocation5]  }
  0x15   :  { %31 = vperm.xlu0 %2640, %v26_v1   ;;  %v47_v4 = vld [vmem:[#allocation2 + $0x28] sm:$0xff]  ;;  %v49_v6 = vld [vmem:[#allocation2 + $0x38] sm:$0xff]  ;;  %v46_v11 = vld [vmem:[#allocation2 + $0x20] sm:$0xff]  ;;  %268 = vmatprep.mubr.f32.mxu1 %v2773_v7  ;;  %s1943_s1 = sshll.u32 %s2777_s0, 4  ;;  %vm1935_vm4 = vcmask 74752   ;;  %s1944_s1 = int_to_ptr.vmem [resolvable:$true] %s1943_s1 }
  0x16   :  { %v2025_v8 = vpack.c.bf16 %v47_v4, %v43_v3  ;;  %v2057_v9 = vpack.c.bf16 %v49_v6, %v45_v5  ;;  %v44_v12 = vld [vmem:[#allocation2 + $0x10] sm:$0xff]  ;;  %v2027_v13 = vpack.c.bf16 %v46_v11, %v42_v10  ;;  %v51_v15 = vld [vmem:[#allocation2 + $0x48] sm:$0xff]  ;;  %v53_v19 = vld [vmem:[#allocation2 + $0x58] sm:$0xff]  ;;  %s2743_s27 = scalar_lea.vmem %s1944_s1, 32  ;;  %p2748_p9 = scmp.lt.s32.totalorder %s1944_s1, %s1944_s1 }
  0x17   :  { %v48_v14 = vld [vmem:[#allocation2 + $0x30] sm:$0xff]  ;;  %v55_v16 = vld [vmem:[#allocation2 + $0x68] sm:$0xff]  ;;  %v57_v20 = vld [vmem:[#allocation2 + $0x78] sm:$0xff]  ;;  %p2744_p8 = scmp.ne.s32.totalorder %s1944_s1, %s2743_s27  ;;  %p2749_p10 = scmp.lt.s32.totalorder %s2743_s27, %s2743_s27 }
  0x18   :  { %2026 = vmatprep.subr.bf16.mxu0 %v2025_v8  ;;  %2058 = vmatprep.subr.bf16.mxu1 %v2057_v9  ;;  %v2059_v17 = vpack.c.bf16 %v48_v14, %v44_v12  ;;  %v2029_v18 = vpack.c.bf16 %v55_v16, %v51_v15  ;;  %v50_v21 = vld [vmem:[#allocation2 + $0x40] sm:$0xff]  ;;  %v2061_v22 = vpack.c.bf16 %v57_v20, %v53_v19  ;;  %v52_v24 = vld [vmem:[#allocation2 + $0x50] sm:$0xff]  ;;  %v59_v28 = vld [vmem:[#allocation2 + $0x88] sm:$0xff] }
  0x19   :  { %34 = vperm.xlu0 %2640, %v27_v2   ;;  %2028 = vmatpush1.bf16.msra.mxu0 %v2027_v13  ;;  %v54_v23 = vld [vmem:[#allocation2 + $0x60] sm:$0xff]  ;;  %v56_v25 = vld [vmem:[#allocation2 + $0x70] sm:$0xff]  ;;  %v63_v29 = vld [vmem:[#allocation2 + $0xa8] sm:$0xff]  ;;  %p2750_p11 = por %p2749_p10, %p2748_p9 }
  0x1a   :  { %2060 = vmatpush1.bf16.msra.mxu1 %v2059_v17  ;;  %2030 = vmatprep.subr.bf16.mxu0 %v2029_v18  ;;  %v2031_v26 = vpack.c.bf16 %v54_v23, %v50_v21  ;;  %v2063_v27 = vpack.c.bf16 %v56_v25, %v52_v24  ;;  %v61_v30 = vld [vmem:[#allocation2 + $0x98] sm:$0xff]  ;;  %v2033_v31 = vpack.c.bf16 %v63_v29, %v59_v28  ;;  %v58_v33 = vld [vmem:[#allocation2 + $0x80] sm:$0xff]  ;;  %v60_v36 = vld [vmem:[#allocation2 + $0x90] sm:$0xff] }
  0x1b   :  { %2062 = vmatprep.subr.bf16.mxu1 %v2061_v22  ;;  %v65_v32 = vld [vmem:[#allocation2 + $0xb8] sm:$0xff]  ;;  %v62_v34 = vld [vmem:[#allocation2 + $0xa0] sm:$0xff]  ;;  %v64_v37 = vld [vmem:[#allocation2 + $0xb0] sm:$0xff]  ;;  %p2751_p12 = pnand %p2750_p11, %p2744_p8 }
  0x1c   :  { %v2065_v35 = vpack.c.bf16 %v65_v32, %v61_v30  ;;  %v67_v38 = vld [vmem:[#allocation2 + $0xc8] sm:$0xff]  ;;  %v2035_v39 = vpack.c.bf16 %v62_v34, %v58_v33  ;;  %v69_v41 = vld [vmem:[#allocation2 + $0xd8] sm:$0xff]  ;;  %v2067_v43 = vpack.c.bf16 %v64_v37, %v60_v36  ;;  %v66_v45 = vld [vmem:[#allocation2 + $0xc0] sm:$0xff] }
  0x1d   :  { %2032 = vmatpush1.bf16.msra.mxu0 %v2031_v26  ;;  %v71_v40 = vld [vmem:[#allocation2 + $0xe8] sm:$0xff]  ;;  %v73_v42 = vld [vmem:[#allocation2 + $0xf8] sm:$0xff]  ;;  %v70_v46 = vld [vmem:[#allocation2 + $0xe0] sm:$0xff] }
  0x1e   :  { %2064 = vmatpush1.bf16.msra.mxu1 %v2063_v27  ;;  %2034 = vmatprep.subr.bf16.mxu0 %v2033_v31  ;;  %v2037_v44 = vpack.c.bf16 %v71_v40, %v67_v38  ;;  %v68_v47 = vld [vmem:[#allocation2 + $0xd0] sm:$0xff]  ;;  %v2069_v48 = vpack.c.bf16 %v73_v42, %v69_v41  ;;  %v75_v50 = vld [vmem:[#allocation2 + $0x108] sm:$0xff]  ;;  %v77_v52 = vld [vmem:[#allocation2 + $0x118] sm:$0xff]  ;;  %v2039_v54 = vpack.c.bf16 %v70_v46, %v66_v45 }
  0x1f   :  { %2066 = vmatprep.subr.bf16.mxu1 %v2065_v35  ;;  %v72_v49 = vld [vmem:[#allocation2 + $0xf0] sm:$0xff]  ;;  %v79_v51 = vld [vmem:[#allocation2 + $0x128] sm:$0xff]  ;;  %v81_v53 = vld [vmem:[#allocation2 + $0x138] sm:$0xff] }
  0x20   :  { %v2071_v55 = vpack.c.bf16 %v72_v49, %v68_v47  ;;  %v2041_v56 = vpack.c.bf16 %v79_v51, %v75_v50  ;;  %v74_v57 = vld [vmem:[#allocation2 + $0x100] sm:$0xff]  ;;  %v76_v59 = vld [vmem:[#allocation2 + $0x110] sm:$0xff]  ;;  %v2073_v60 = vpack.c.bf16 %v81_v53, %v77_v52  ;;  %v83_v62 = vld [vmem:[#allocation2 + $0x148] sm:$0xff] }
  0x21   :  { %2036 = vmatpush1.bf16.msra.mxu0 %v2035_v39  ;;  %v78_v58 = vld [vmem:[#allocation2 + $0x120] sm:$0xff]  ;;  %v80_v61 = vld [vmem:[#allocation2 + $0x130] sm:$0xff]  ;;  %v87_v63 = vld [vmem:[#allocation2 + $0x168] sm:$0xff] }
  0x22   :  { %2068 = vmatpush1.bf16.msra.mxu1 %v2067_v43  ;;  %2038 = vmatprep.subr.bf16.mxu0 %v2037_v44  ;;  %v85_v0 = vld [vmem:[#allocation2 + $0x158] sm:$0xff]  ;;  %v2043_v2 = vpack.c.bf16 %v78_v58, %v74_v57  ;;  %v2075_v3 = vpack.c.bf16 %v80_v61, %v76_v59  ;;  %v2045_v4 = vpack.c.bf16 %v87_v63, %v83_v62  ;;  %v82_v5 = vld [vmem:[#allocation2 + $0x140] sm:$0xff]  ;;  %v84_v8 = vld [vmem:[#allocation2 + $0x150] sm:$0xff]  ;;  %v28_v43 = vlaneseq }
  0x23   :  { %2070 = vmatprep.subr.bf16.mxu1 %v2069_v48  ;;  %v89_v1 = vld [vmem:[#allocation2 + $0x178] sm:$0xff]  ;;  %v86_v6 = vld [vmem:[#allocation2 + $0x160] sm:$0xff]  ;;  %v88_v10 = vld [vmem:[#allocation2 + $0x170] sm:$0xff] }
  0x24   :  { %v2077_v9 = vpack.c.bf16 %v89_v1, %v85_v0  ;;  %v91_v11 = vld [vmem:[#allocation2 + $0x188] sm:$0xff]  ;;  %v93_v13 = vld [vmem:[#allocation2 + $0x198] sm:$0xff]  ;;  %v2047_v15 = vpack.c.bf16 %v86_v6, %v82_v5  ;;  %v2079_v16 = vpack.c.bf16 %v88_v10, %v84_v8  ;;  %v90_v18 = vld [vmem:[#allocation2 + $0x180] sm:$0xff]  ;;  %v29_v48 = vand.u32 127, %v28_v43 }
  0x25   :  { %2040 = vmatpush1.bf16.msra.mxu0 %v2039_v54  ;;  %v95_v12 = vld [vmem:[#allocation2 + $0x1a8] sm:$0xff]  ;;  %v97_v14 = vld [vmem:[#allocation2 + $0x1b8] sm:$0xff]  ;;  %v94_v19 = vld [vmem:[#allocation2 + $0x1a0] sm:$0xff] }
  0x26   :  { %2072 = vmatpush1.bf16.msra.mxu1 %v2071_v55  ;;  %2042 = vmatprep.subr.bf16.mxu0 %v2041_v56  ;;  %v2049_v17 = vpack.c.bf16 %v95_v12, %v91_v11  ;;  %v92_v20 = vld [vmem:[#allocation2 + $0x190] sm:$0xff]  ;;  %v2081_v21 = vpack.c.bf16 %v97_v14, %v93_v13  ;;  %v99_v23 = vld [vmem:[#allocation2 + $0x1c8] sm:$0xff]  ;;  %v101_v25 = vld [vmem:[#allocation2 + $0x1d8] sm:$0xff]  ;;  %v2051_v27 = vpack.c.bf16 %v94_v19, %v90_v18 }
  0x27   :  { %2074 = vmatprep.subr.bf16.mxu1 %v2073_v60  ;;  %v96_v22 = vld [vmem:[#allocation2 + $0x1b0] sm:$0xff]  ;;  %v103_v24 = vld [vmem:[#allocation2 + $0x1e8] sm:$0xff]  ;;  %v105_v26 = vld [vmem:[#allocation2 + $0x1f8] sm:$0xff] }
  0x28   :  { %v2083_v28 = vpack.c.bf16 %v96_v22, %v92_v20  ;;  %v2053_v29 = vpack.c.bf16 %v103_v24, %v99_v23  ;;  %v98_v30 = vld [vmem:[#allocation2 + $0x1c0] sm:$0xff]  ;;  %v100_v32 = vld [vmem:[#allocation2 + $0x1d0] sm:$0xff]  ;;  %v2085_v33 = vpack.c.bf16 %v105_v26, %v101_v25  ;;  %v282_v35 = vld [vmem:[#allocation2 + $0x208] sm:$0xff] }
  0x29   :  { %2044 = vmatpush1.bf16.msra.mxu0 %v2043_v2  ;;  %v102_v31 = vld [vmem:[#allocation2 + $0x1e0] sm:$0xff]  ;;  %v104_v34 = vld [vmem:[#allocation2 + $0x1f0] sm:$0xff]  ;;  %v286_v36 = vld [vmem:[#allocation2 + $0x228] sm:$0xff]  ;;  %v2774_v2 = vmov 1.0  }
  0x2a   :  { %2076 = vmatpush1.bf16.msra.mxu1 %v2075_v3  ;;  %2046 = vmatprep.subr.bf16.mxu0 %v2045_v4  ;;  %v284_v37 = vld [vmem:[#allocation2 + $0x218] sm:$0xff]  ;;  %v2055_v39 = vpack.c.bf16 %v102_v31, %v98_v30  ;;  %v2087_v40 = vpack.c.bf16 %v104_v34, %v100_v32  ;;  %v2813_v41 = vpack.c.bf16 %v286_v36, %v282_v35  ;;  %v281_v44 = vld [vmem:[#allocation2 + $0x200] sm:$0xff]  ;;  %v283_v46 = vld [vmem:[#allocation2 + $0x210] sm:$0xff] }
  0x2b   :  { %2078 = vmatprep.subr.bf16.mxu1 %v2077_v9  ;;  %v288_v38 = vld [vmem:[#allocation2 + $0x238] sm:$0xff]  ;;  %v285_v45 = vld [vmem:[#allocation2 + $0x220] sm:$0xff]  ;;  %v287_v47 = vld [vmem:[#allocation2 + $0x230] sm:$0xff] }
  0x2c   :  { %v2815_v42 = vpack.c.bf16 %v288_v38, %v284_v37  ;;  %v290_v49 = vld [vmem:[#allocation2 + $0x248] sm:$0xff]  ;;  %v292_v51 = vld [vmem:[#allocation2 + $0x258] sm:$0xff]  ;;  %v2820_v53 = vpack.c.bf16 %v285_v45, %v281_v44  ;;  %v2822_v54 = vpack.c.bf16 %v287_v47, %v283_v46  ;;  %v289_v55 = vld [vmem:[#allocation2 + $0x240] sm:$0xff] }
  0x2d   :  { %2048 = vmatpush1.bf16.msra.mxu0 %v2047_v15  ;;  %v294_v50 = vld [vmem:[#allocation2 + $0x268] sm:$0xff]  ;;  %v296_v52 = vld [vmem:[#allocation2 + $0x278] sm:$0xff]  ;;  %v293_v56 = vld [vmem:[#allocation2 + $0x260] sm:$0xff] }
  0x2e   :  { %2080 = vmatpush1.bf16.msra.mxu1 %v2079_v16  ;;  %2050 = vmatprep.subr.bf16.mxu0 %v2049_v17  ;;  %v291_v58 = vld [vmem:[#allocation2 + $0x250] sm:$0xff]  ;;  %v298_v60 = vld [vmem:[#allocation2 + $0x288] sm:$0xff]  ;;  %v2824_v61 = vpack.c.bf16 %v294_v50, %v290_v49  ;;  %v2826_v62 = vpack.c.bf16 %v296_v52, %v292_v51  ;;  %v300_v0 = vld [vmem:[#allocation2 + $0x298] sm:$0xff]  ;;  %v2830_v3 = vpack.c.bf16 %v293_v56, %v289_v55 }
  0x2f   :  { %2082 = vmatprep.subr.bf16.mxu1 %v2081_v21  ;;  %v295_v59 = vld [vmem:[#allocation2 + $0x270] sm:$0xff]  ;;  %v302_v63 = vld [vmem:[#allocation2 + $0x2a8] sm:$0xff]  ;;  %v304_v1 = vld [vmem:[#allocation2 + $0x2b8] sm:$0xff] }
  0x30   :  { %v2832_v4 = vpack.c.bf16 %v295_v59, %v291_v58  ;;  %v297_v5 = vld [vmem:[#allocation2 + $0x280] sm:$0xff]  ;;  %v2836_v9 = vpack.c.bf16 %v302_v63, %v298_v60  ;;  %v2838_v10 = vpack.c.bf16 %v304_v1, %v300_v0  ;;  %v299_v11 = vld [vmem:[#allocation2 + $0x290] sm:$0xff]  ;;  %v306_v13 = vld [vmem:[#allocation2 + $0x2c8] sm:$0xff] }
  0x31   :  { %2052 = vmatpush1.bf16.msra.mxu0 %v2051_v27  ;;  %v301_v6 = vld [vmem:[#allocation2 + $0x2a0] sm:$0xff]  ;;  %v303_v12 = vld [vmem:[#allocation2 + $0x2b0] sm:$0xff]  ;;  %v310_v14 = vld [vmem:[#allocation2 + $0x2e8] sm:$0xff] }
  0x32   :  { %2084 = vmatpush1.bf16.msra.mxu1 %v2083_v28  ;;  %2054 = vmatprep.subr.bf16.mxu0 %v2053_v29  ;;  %v308_v15 = vld [vmem:[#allocation2 + $0x2d8] sm:$0xff]  ;;  %v2844_v17 = vpack.c.bf16 %v301_v6, %v297_v5  ;;  %v2846_v18 = vpack.c.bf16 %v303_v12, %v299_v11  ;;  %v305_v19 = vld [vmem:[#allocation2 + $0x2c0] sm:$0xff]  ;;  %v2850_v21 = vpack.c.bf16 %v310_v14, %v306_v13  ;;  %v307_v23 = vld [vmem:[#allocation2 + $0x2d0] sm:$0xff] }
  0x33   :  { %2086 = vmatprep.subr.bf16.mxu1 %v2085_v33  ;;  %v312_v16 = vld [vmem:[#allocation2 + $0x2f8] sm:$0xff]  ;;  %v309_v20 = vld [vmem:[#allocation2 + $0x2e0] sm:$0xff]  ;;  %v311_v24 = vld [vmem:[#allocation2 + $0x2f0] sm:$0xff] }
  0x34   :  { %v2852_v22 = vpack.c.bf16 %v312_v16, %v308_v15  ;;  %v314_v25 = vld [vmem:[#allocation2 + $0x308] sm:$0xff]  ;;  %v316_v27 = vld [vmem:[#allocation2 + $0x318] sm:$0xff]  ;;  %v2858_v29 = vpack.c.bf16 %v309_v20, %v305_v19  ;;  %v2860_v30 = vpack.c.bf16 %v311_v24, %v307_v23  ;;  %v313_v31 = vld [vmem:[#allocation2 + $0x300] sm:$0xff] }
  0x35   :  { %2056 = vmatpush1.bf16.msra.mxu0 %v2055_v39  ;;  %v318_v26 = vld [vmem:[#allocation2 + $0x328] sm:$0xff]  ;;  %v320_v28 = vld [vmem:[#allocation2 + $0x338] sm:$0xff]  ;;  %v317_v32 = vld [vmem:[#allocation2 + $0x320] sm:$0xff] }
  0x36   :  { %2088 = vmatpush1.bf16.msra.mxu1 %v2087_v40  ;;  %2090 = vmatprep.subr.bf16.mxu0 %v2813_v41  ;;  %v2864_v33 = vpack.c.bf16 %v318_v26, %v314_v25  ;;  %v2866_v34 = vpack.c.bf16 %v320_v28, %v316_v27  ;;  %v315_v35 = vld [vmem:[#allocation2 + $0x310] sm:$0xff]  ;;  %v322_v37 = vld [vmem:[#allocation2 + $0x348] sm:$0xff]  ;;  %v324_v39 = vld [vmem:[#allocation2 + $0x358] sm:$0xff]  ;;  %v2870_v44 = vpack.c.bf16 %v317_v32, %v313_v31  ;;  %v108_v27 = vshrl.u32 %v28_v43, 7 }
  0x37   :  { %2122 = vmatprep.subr.bf16.mxu1 %v2815_v42  ;;  %v319_v36 = vld [vmem:[#allocation2 + $0x330] sm:$0xff]  ;;  %v326_v38 = vld [vmem:[#allocation2 + $0x368] sm:$0xff]  ;;  %v328_v40 = vld [vmem:[#allocation2 + $0x378] sm:$0xff] }
  0x38   :  { %v2872_v45 = vpack.c.bf16 %v319_v36, %v315_v35  ;;  %v321_v46 = vld [vmem:[#allocation2 + $0x340] sm:$0xff]  ;;  %v2878_v49 = vpack.c.bf16 %v328_v40, %v324_v39  ;;  %v323_v50 = vld [vmem:[#allocation2 + $0x350] sm:$0xff]  ;;  %v330_v52 = vld [vmem:[#allocation2 + $0x388] sm:$0xff]  ;;  %v109_v28 = vsub.s32 0, %v108_v27  ;;  %v117_v31 = vsub.s32 2, %v108_v27 }
  0x39   :  { %v325_v47 = vld [vmem:[#allocation2 + $0x360] sm:$0xff]  ;;  %v327_v51 = vld [vmem:[#allocation2 + $0x370] sm:$0xff]  ;;  %v334_v55 = vld [vmem:[#allocation2 + $0x3a8] sm:$0xff]  ;;  %v113_v35 = vsub.s32 1, %v108_v27  ;;  %v121_v36 = vsub.s32 3, %v108_v27 }
  0x3a   :  { %v332_v56 = vld [vmem:[#allocation2 + $0x398] sm:$0xff]  ;;  %v2882_v58 = vpack.c.bf16 %v325_v47, %v321_v46  ;;  %v2884_v59 = vpack.c.bf16 %v327_v51, %v323_v50  ;;  %v329_v60 = vld [vmem:[#allocation2 + $0x380] sm:$0xff]  ;;  %v2888_v0 = vpack.c.bf16 %v334_v55, %v330_v52  ;;  %v335_v5 = vld [vmem:[#allocation2 + $0x3b0] sm:$0xff] }
  0x3b   :  { %v333_v63 = vld [vmem:[#allocation2 + $0x3a0] sm:$0xff]  ;;  %v338_v6 = vld [vmem:[#allocation2 + $0x3c8] sm:$0xff]  ;;  %v340_v11 = vld [vmem:[#allocation2 + $0x3d8] sm:$0xff] }
  0x3c   :  { %v344_v12 = vld [vmem:[#allocation2 + $0x3f8] sm:$0xff]  ;;  %v2894_v13 = vpack.c.bf16 %v333_v63, %v329_v60  ;;  %v337_v15 = vld [vmem:[#allocation2 + $0x3c0] sm:$0xff]  ;;  %v339_v23 = vld [vmem:[#allocation2 + $0x3d0] sm:$0xff] }
  0x3d   :  { %v2902_v19 = vpack.c.bf16 %v344_v12, %v340_v11  ;;  %v341_v20 = vld [vmem:[#allocation2 + $0x3e0] sm:$0xff]  ;;  %v343_v24 = vld [vmem:[#allocation2 + $0x3f0] sm:$0xff] }
  0x3e   :  { %v2906_v25 = vpack.c.bf16 %v341_v20, %v337_v15  ;;  %v2908_v26 = vpack.c.bf16 %v343_v24, %v339_v23  ;;  %v41_v32 = vld [vmem:[#allocation2 + $0x400] ss:$8 sm:$0xf] }
  0x3f   :  { %v114_v39 = vrot.slane %v41_v32, %v113_v35  ;;  %v122_v40 = vrot.slane %v41_v32, %v121_v36 }
  0x94   :  { %v32_v57 = vpop.permute.xlu0 %31 }
  0x95   :  { %vm36_vm0 = vcmp.eq.s32.totalorder %v29_v48, %v32_v57  ;;  %v336_v57 = vld [vmem:[#allocation2 + $0x3b8] sm:$0xff] }
  0x96   :  { %1952 = vmatmul.mubr.msk.f32.vlgmr.msra.gmra.mrb[0].mxu0 %vm36_vm0, %v2774_v2  ;;  %1954 = vmatmul.mubr.msk.f32.vlgmr.msra.gmra.mrb[0].mxu1 %vm36_vm0, %v2774_v2  ;;  %v2890_v1 = vpack.c.bf16 %v336_v57, %v332_v56 }
  0x97   :  { %2092 = vmatpush1.bf16.msra.mxu0 %v2820_v53  ;;  %2124 = vmatpush1.bf16.msra.mxu1 %v2822_v54 }
  0x98   :  { %v35_v8 = vpop.permute.xlu0 %34  ;;  %197 = vmatprep.mubr.f32.mxu0 %v2773_v7  ;;  %274 = vmatprep.mubr.f32.mxu1 %v2773_v7 }
  0x99   :  { %vm37_vm1 = vcmp.eq.s32.totalorder %v29_v48, %v35_v8  ;;  %2094 = vmatprep.subr.bf16.mxu0 %v2824_v61  ;;  %2126 = vmatprep.subr.bf16.mxu1 %v2826_v62  ;;  %v2876_v48 = vpack.c.bf16 %v326_v38, %v322_v37  ;;  %v342_v8 = vld [vmem:[#allocation2 + $0x3e8] sm:$0xff]  ;;  %v110_v37 = vrot.slane %v41_v32, %v109_v28 }
  0x9a   :  { %1953 = vmatmul.mubr.msk.f32.gmra.mrb[2].mxu0 %vm37_vm1, %v2774_v2  ;;  %1955 = vmatmul.mubr.msk.f32.gmra.mrb[2].mxu1 %vm37_vm1, %v2774_v2  ;;  %v331_v2 = vld [vmem:[#allocation2 + $0x390] sm:$0xff]  ;;  %v2900_v16 = vpack.c.bf16 %v342_v8, %v338_v6  ;;  %v118_v38 = vrot.slane %v41_v32, %v117_v31 }
  0x9b   :  { %2096 = vmatpush1.bf16.msra.mxu0 %v2830_v3  ;;  %2128 = vmatpush1.bf16.msra.mxu1 %v2832_v4  ;;  %v2896_v14 = vpack.c.bf16 %v335_v5, %v331_v2 }
  0x9c   :  { %2098 = vmatprep.subr.bf16.mxu0 %v2836_v9  ;;  %2130 = vmatprep.subr.bf16.mxu1 %v2838_v10 }
  0x9d   :  { %409 = vmatprep.mubr.f32.mxu0 %v2773_v7  ;;  %480 = vmatprep.mubr.f32.mxu1 %v2773_v7 }
  0x9f   :  { %2100 = vmatpush1.bf16.msra.mxu0 %v2844_v17  ;;  %2132 = vmatpush1.bf16.msra.mxu1 %v2846_v18 }
  0xa0   :  { %2102 = vmatprep.subr.bf16.mxu0 %v2850_v21  ;;  %2134 = vmatprep.subr.bf16.mxu1 %v2852_v22 }
  0xa3   :  { %2104 = vmatpush1.bf16.msra.mxu0 %v2858_v29  ;;  %2136 = vmatpush1.bf16.msra.mxu1 %v2860_v30 }
  0xa4   :  { %2106 = vmatprep.subr.bf16.mxu0 %v2864_v33  ;;  %2138 = vmatprep.subr.bf16.mxu1 %v2866_v34 }
  0xa7   :  { %2108 = vmatpush1.bf16.msra.mxu0 %v2870_v44  ;;  %2140 = vmatpush1.bf16.msra.mxu1 %v2872_v45 }
  0xa8   :  { %2110 = vmatprep.subr.bf16.mxu0 %v2876_v48  ;;  %2142 = vmatprep.subr.bf16.mxu1 %v2878_v49 }
  0xab   :  { %2112 = vmatpush1.bf16.msra.mxu0 %v2882_v58  ;;  %2144 = vmatpush1.bf16.msra.mxu1 %v2884_v59 }
  0xac   :  { %2114 = vmatprep.subr.bf16.mxu0 %v2888_v0  ;;  %2146 = vmatprep.subr.bf16.mxu1 %v2890_v1 }
  0xaf   :  { %2116 = vmatpush1.bf16.msra.mxu0 %v2894_v13  ;;  %2148 = vmatpush1.bf16.msra.mxu1 %v2896_v14 }
  0xb0   :  { %2118 = vmatprep.subr.bf16.mxu0 %v2900_v16  ;;  %2150 = vmatprep.subr.bf16.mxu1 %v2902_v19 }
  0xb3   :  { %2120 = vmatpush1.bf16.msra.mxu0 %v2906_v25  ;;  %2152 = vmatpush1.bf16.msra.mxu1 %v2908_v26 }
  0xb4   :  { %2154 = vmatprep.subr.bf16.mxu0 %v2813_v41  ;;  %2186 = vmatprep.subr.bf16.mxu1 %v2815_v42 }
  0xb6   :  { %410 = vmatmul.mubr.f32.vlgmr.msra.gmra.mrb[4].mxu0 %v2773_v7  ;;  %481 = vmatmul.mubr.f32.vlgmr.msra.gmra.mrb[4].mxu1 %v2773_v7 }
  0xb7   :  { %2156 = vmatpush1.bf16.msra.mxu0 %v2820_v53  ;;  %2188 = vmatpush1.bf16.msra.mxu1 %v2822_v54 }
  0xb8   :  { %2158 = vmatprep.subr.bf16.mxu0 %v2824_v61  ;;  %2190 = vmatprep.subr.bf16.mxu1 %v2826_v62 }
  0xb9   :  { %573 = vmatprep.mubr.f32.mxu0 %v2773_v7  ;;  %644 = vmatprep.mubr.f32.mxu1 %v2773_v7 }
  0xbb   :  { %2160 = vmatpush1.bf16.msra.mxu0 %v2830_v3  ;;  %2192 = vmatpush1.bf16.msra.mxu1 %v2832_v4 }
  0xbc   :  { %2162 = vmatprep.subr.bf16.mxu0 %v2836_v9  ;;  %2194 = vmatprep.subr.bf16.mxu1 %v2838_v10 }
  0xbf   :  { %2164 = vmatpush1.bf16.msra.mxu0 %v2844_v17  ;;  %2196 = vmatpush1.bf16.msra.mxu1 %v2846_v18 }
  0xc0   :  { %2166 = vmatprep.subr.bf16.mxu0 %v2850_v21  ;;  %2198 = vmatprep.subr.bf16.mxu1 %v2852_v22 }
  0xc3   :  { %2168 = vmatpush1.bf16.msra.mxu0 %v2858_v29  ;;  %2200 = vmatpush1.bf16.msra.mxu1 %v2860_v30 }
  0xc4   :  { %2170 = vmatprep.subr.bf16.mxu0 %v2864_v33  ;;  %2202 = vmatprep.subr.bf16.mxu1 %v2866_v34 }
  0xc7   :  { %2172 = vmatpush1.bf16.msra.mxu0 %v2870_v44  ;;  %2204 = vmatpush1.bf16.msra.mxu1 %v2872_v45 }
  0xc8   :  { %2174 = vmatprep.subr.bf16.mxu0 %v2876_v48  ;;  %2206 = vmatprep.subr.bf16.mxu1 %v2878_v49 }
  0xcb   :  { %2176 = vmatpush1.bf16.msra.mxu0 %v2882_v58  ;;  %2208 = vmatpush1.bf16.msra.mxu1 %v2884_v59 }
  0xcc   :  { %2178 = vmatprep.subr.bf16.mxu0 %v2888_v0  ;;  %2210 = vmatprep.subr.bf16.mxu1 %v2890_v1 }
  0xcf   :  { %2180 = vmatpush1.bf16.msra.mxu0 %v2894_v13  ;;  %2212 = vmatpush1.bf16.msra.mxu1 %v2896_v14 }
  0xd0   :  { %2182 = vmatprep.subr.bf16.mxu0 %v2900_v16  ;;  %2214 = vmatprep.subr.bf16.mxu1 %v2902_v19 }
  0xd3   :  { %2184 = vmatpush1.bf16.msra.mxu0 %v2906_v25  ;;  %2216 = vmatpush1.bf16.msra.mxu1 %v2908_v26 }
  0xd4   :  { %2218 = vmatprep.subr.bf16.mxu0 %v2813_v41  ;;  %2250 = vmatprep.subr.bf16.mxu1 %v2815_v42 }
 0x169   :  { %v193_v46 = vpop.f32.mrb[0].mxu0  ;;  %v270_v47 = vpop.f32.mrb[0].mxu1 }
 0x16a   :  { %v2953_v50 = vadd.f32 %v193_v46, %v110_v37  ;;  %v2955_v51 = vadd.f32 %v270_v47, %v118_v38  ;;  %v195_v52 = vpop.f32.mrb[1].mxu0  ;;  %v272_v55 = vpop.f32.mrb[1].mxu1 }
 0x16b   :  { %v2957_v56 = vadd.f32 %v195_v52, %v114_v39  ;;  %v2959_v43 = vadd.f32 %v272_v55, %v122_v40 }
 0x16d   :  { %v199_v57 = vpop.f32.mrb[2].mxu0  ;;  %v276_v60 = vpop.f32.mrb[2].mxu1 }
 0x16e   :  { %v2961_v63 = vadd.f32 %v199_v57, %v110_v37  ;;  %v2963_v2 = vadd.f32 %v276_v60, %v118_v38  ;;  %v201_v5 = vpop.f32.mrb[3].mxu0  ;;  %v278_v6 = vpop.f32.mrb[3].mxu1 }
 0x16f   :  { %v2965_v8 = vadd.f32 %v201_v5, %v114_v39  ;;  %v2967_v11 = vadd.f32 %v278_v6, %v122_v40 }
 0x189   :  { %v411_v12 = vpop.f32.mrb[4].mxu0  ;;  %v482_v15 = vpop.f32.mrb[4].mxu1 }
 0x18a   :  { %v487_v20 = vadd.f32 %v411_v12, %v2953_v50  ;;  %v413_v23 = vpop.f32.mrb[5].mxu0  ;;  %v484_v24 = vpop.f32.mrb[5].mxu1  ;;  %v489_v32 = vadd.f32 %v482_v15, %v2955_v51 }
 0x18b   :  { %v488_v27 = vadd.f32 %v413_v23, %v2957_v56  ;;  %v490_v35 = vadd.f32 %v484_v24, %v2959_v43 }
 0x18c   :  { %v491_v28 = vmul.f32 0.5, %v487_v20 }
 0x18d   :  { %v495_v31 = vmul.f32 0.5, %v488_v27  ;;  %v500_v36 = vmul.f32 0.5, %v490_v35 }
 0x18e   :  { %2641 = vtanh.f32 %v491_v28 }
 0x18f   :  { %2643 = vtanh.f32 %v495_v31 }
 0x190   :  { %2645 = vtanh.f32 %v489_v32 }
 0x191   :  { %2647 = vtanh.f32 %v500_v36 }
 0x198   :  { %v2642_v37 = vpop.eup %2641 }
 0x199   :  { %v2644_v38 = vpop.eup %2643  ;;  %v493_v39 = vmul.f32 0.5, %v2642_v37 }
 0x19a   :  { %v497_v40 = vmul.f32 0.5, %v2644_v38  ;;  %v2646_v47 = vpop.eup %2645 }
 0x19b   :  { %v494_v46 = vadd.f32 0.5, %v493_v39  ;;  %v2648_v5 = vpop.eup %2647 }
 0x19c   :  { %v498_v52 = vadd.f32 0.5, %v497_v40  ;;  %v502_v6 = vmul.f32 0.5, %v2648_v5 }
 0x19d   :  { %v505_v55 = vmul.f32 %v2646_v47, %v494_v46 }
 0x19e   :  { %v504_v57 = vmul.f32 0.0, %v498_v52  ;;  %v503_v12 = vadd.f32 0.5, %v502_v6 }
 0x1a0   :  { %v2973_v60 = vadd.f32 %v505_v55, %v504_v57 }
 0x1a2   :  { %2649 = vtanh.f32 %v2973_v60 }
 0x1ac   :  { %v2650_v15 = vpop.eup %2649 }
 0x1ad   :  { %v508_v20 = vmul.f32 %v2650_v15, %v503_v12 }
 0x1af   :  { %574 = vmatmul.mubr.f32.vlgmr.msra.gmra.mrb[6].mxu0 %v508_v20  ;;  %645 = vmatmul.mubr.f32.vlgmr.msra.gmra.mrb[6].mxu1 %v508_v20  ;;  %v681_v20 = vrot.slane %v2973_v60, 6 }
 0x1b0   :  { %2220 = vmatpush1.bf16.msra.mxu0 %v2820_v53  ;;  %2252 = vmatpush1.bf16.msra.mxu1 %v2822_v54 }
 0x1b1   :  { %2222 = vmatprep.subr.bf16.mxu0 %v2824_v61  ;;  %2254 = vmatprep.subr.bf16.mxu1 %v2826_v62 }
 0x1b2   :  { %755 = vmatprep.mubr.f32.mxu0 %v2773_v7  ;;  %826 = vmatprep.mubr.f32.mxu1 %v2773_v7 }
 0x1b4   :  { %2224 = vmatpush1.bf16.msra.mxu0 %v2830_v3  ;;  %2256 = vmatpush1.bf16.msra.mxu1 %v2832_v4 }
 0x1b5   :  { %2226 = vmatprep.subr.bf16.mxu0 %v2836_v9  ;;  %2258 = vmatprep.subr.bf16.mxu1 %v2838_v10 }
 0x1b8   :  { %2228 = vmatpush1.bf16.msra.mxu0 %v2844_v17  ;;  %2260 = vmatpush1.bf16.msra.mxu1 %v2846_v18 }
 0x1b9   :  { %2230 = vmatprep.subr.bf16.mxu0 %v2850_v21  ;;  %2262 = vmatprep.subr.bf16.mxu1 %v2852_v22 }
 0x1bc   :  { %2232 = vmatpush1.bf16.msra.mxu0 %v2858_v29  ;;  %2264 = vmatpush1.bf16.msra.mxu1 %v2860_v30 }
 0x1bd   :  { %2234 = vmatprep.subr.bf16.mxu0 %v2864_v33  ;;  %2266 = vmatprep.subr.bf16.mxu1 %v2866_v34 }
 0x1c0   :  { %2236 = vmatpush1.bf16.msra.mxu0 %v2870_v44  ;;  %2268 = vmatpush1.bf16.msra.mxu1 %v2872_v45 }
 0x1c1   :  { %2238 = vmatprep.subr.bf16.mxu0 %v2876_v48  ;;  %2270 = vmatprep.subr.bf16.mxu1 %v2878_v49 }
 0x1c4   :  { %2240 = vmatpush1.bf16.msra.mxu0 %v2882_v58  ;;  %2272 = vmatpush1.bf16.msra.mxu1 %v2884_v59 }
 0x1c5   :  { %2242 = vmatprep.subr.bf16.mxu0 %v2888_v0  ;;  %2274 = vmatprep.subr.bf16.mxu1 %v2890_v1 }
 0x1c8   :  { %2244 = vmatpush1.bf16.msra.mxu0 %v2894_v13  ;;  %2276 = vmatpush1.bf16.msra.mxu1 %v2896_v14 }
 0x1c9   :  { %2246 = vmatprep.subr.bf16.mxu0 %v2900_v16  ;;  %2278 = vmatprep.subr.bf16.mxu1 %v2902_v19 }
 0x1cc   :  { %2248 = vmatpush1.bf16.msra.mxu0 %v2906_v25  ;;  %2280 = vmatpush1.bf16.msra.mxu1 %v2908_v26 }
 0x1cd   :  { %2282 = vmatprep.subr.bf16.mxu0 %v2813_v41  ;;  %2314 = vmatprep.subr.bf16.mxu1 %v2815_v42 }
 0x282   :  { %v575_v23 = vpop.f32.mrb[6].mxu0  ;;  %v646_v24 = vpop.f32.mrb[6].mxu1 }
 0x283   :  { %v655_v27 = vrot.slane %v575_v23, 6  ;;  %v577_v28 = vpop.f32.mrb[7].mxu0  ;;  %v648_v31 = vpop.f32.mrb[7].mxu1  ;;  %v657_v36 = vrot.slane %v646_v24, 6 }
 0x284   :  { %v656_v32 = vrot.slane %v577_v28, 6  ;;  %v658_v46 = vrot.slane %v648_v31, 6 }
 0x285   :  { %v663_v35 = vadd.f32 %v655_v27, %v2953_v50  ;;  %v665_v40 = vadd.f32 %v657_v36, %v2955_v51 }
 0x286   :  { %v664_v37 = vadd.f32 %v656_v32, %v2957_v56  ;;  %v666_v47 = vadd.f32 %v658_v46, %v2959_v43 }
 0x287   :  { %v667_v38 = vmul.f32 0.5, %v663_v35 }
 0x288   :  { %v671_v39 = vmul.f32 0.5, %v664_v37  ;;  %v676_v52 = vmul.f32 0.5, %v666_v47 }
 0x289   :  { %2651 = vtanh.f32 %v667_v38 }
 0x28a   :  { %2653 = vtanh.f32 %v671_v39 }
 0x28b   :  { %2655 = vtanh.f32 %v665_v40 }
 0x28c   :  { %2657 = vtanh.f32 %v676_v52 }
 0x293   :  { %v2652_v55 = vpop.eup %2651 }
 0x294   :  { %v2654_v57 = vpop.eup %2653  ;;  %v669_v5 = vmul.f32 0.5, %v2652_v55 }
 0x295   :  { %v673_v6 = vmul.f32 0.5, %v2654_v57  ;;  %v2656_v15 = vpop.eup %2655 }
 0x296   :  { %v670_v12 = vadd.f32 0.5, %v669_v5  ;;  %v2658_v31 = vpop.eup %2657 }
 0x297   :  { %v674_v23 = vadd.f32 0.5, %v673_v6  ;;  %v678_v32 = vmul.f32 0.5, %v2658_v31 }
 0x298   :  { %v684_v24 = vmul.f32 %v2656_v15, %v670_v12 }
 0x299   :  { %v683_v27 = vmul.f32 %v681_v20, %v674_v23  ;;  %v679_v35 = vadd.f32 0.5, %v678_v32 }
 0x29b   :  { %v3015_v28 = vadd.f32 %v684_v24, %v683_v27 }
 0x29d   :  { %2659 = vtanh.f32 %v3015_v28 }
 0x2a7   :  { %v2660_v36 = vpop.eup %2659 }
 0x2a8   :  { %v687_v37 = vmul.f32 %v2660_v36, %v679_v35 }
 0x2aa   :  { %v689_v38 = vrot.slane %v687_v37, 2 }
 0x2ac   :  { %756 = vmatmul.mubr.f32.vlgmr.msra.gmra.mrb[8].mxu0 %v689_v38  ;;  %827 = vmatmul.mubr.f32.vlgmr.msra.gmra.mrb[8].mxu1 %v689_v38 }
 0x2ad   :  { %2284 = vmatpush1.bf16.msra.mxu0 %v2820_v53  ;;  %2316 = vmatpush1.bf16.msra.mxu1 %v2822_v54 }
 0x2ae   :  { %2286 = vmatprep.subr.bf16.mxu0 %v2824_v61  ;;  %2318 = vmatprep.subr.bf16.mxu1 %v2826_v62 }
 0x2af   :  { %937 = vmatprep.mubr.f32.mxu0 %v2773_v7  ;;  %1008 = vmatprep.mubr.f32.mxu1 %v2773_v7 }
 0x2b1   :  { %2288 = vmatpush1.bf16.msra.mxu0 %v2830_v3  ;;  %2320 = vmatpush1.bf16.msra.mxu1 %v2832_v4 }
 0x2b2   :  { %2290 = vmatprep.subr.bf16.mxu0 %v2836_v9  ;;  %2322 = vmatprep.subr.bf16.mxu1 %v2838_v10 }
 0x2b5   :  { %2292 = vmatpush1.bf16.msra.mxu0 %v2844_v17  ;;  %2324 = vmatpush1.bf16.msra.mxu1 %v2846_v18 }
 0x2b6   :  { %2294 = vmatprep.subr.bf16.mxu0 %v2850_v21  ;;  %2326 = vmatprep.subr.bf16.mxu1 %v2852_v22 }
 0x2b9   :  { %2296 = vmatpush1.bf16.msra.mxu0 %v2858_v29  ;;  %2328 = vmatpush1.bf16.msra.mxu1 %v2860_v30 }
 0x2ba   :  { %2298 = vmatprep.subr.bf16.mxu0 %v2864_v33  ;;  %2330 = vmatprep.subr.bf16.mxu1 %v2866_v34 }
 0x2bd   :  { %2300 = vmatpush1.bf16.msra.mxu0 %v2870_v44  ;;  %2332 = vmatpush1.bf16.msra.mxu1 %v2872_v45 }
 0x2be   :  { %2302 = vmatprep.subr.bf16.mxu0 %v2876_v48  ;;  %2334 = vmatprep.subr.bf16.mxu1 %v2878_v49 }
 0x2c1   :  { %2304 = vmatpush1.bf16.msra.mxu0 %v2882_v58  ;;  %2336 = vmatpush1.bf16.msra.mxu1 %v2884_v59 }
 0x2c2   :  { %2306 = vmatprep.subr.bf16.mxu0 %v2888_v0  ;;  %2338 = vmatprep.subr.bf16.mxu1 %v2890_v1 }
 0x2c5   :  { %2308 = vmatpush1.bf16.msra.mxu0 %v2894_v13  ;;  %2340 = vmatpush1.bf16.msra.mxu1 %v2896_v14 }
 0x2c6   :  { %2310 = vmatprep.subr.bf16.mxu0 %v2900_v16  ;;  %2342 = vmatprep.subr.bf16.mxu1 %v2902_v19 }
 0x2c9   :  { %2312 = vmatpush1.bf16.msra.mxu0 %v2906_v25  ;;  %2344 = vmatpush1.bf16.msra.mxu1 %v2908_v26 }
 0x2ca   :  { %2346 = vmatprep.subr.bf16.mxu0 %v2813_v41  ;;  %2378 = vmatprep.subr.bf16.mxu1 %v2815_v42 }
 0x37f   :  { %v757_v60 = vpop.f32.mrb[8].mxu0  ;;  %v828_v39 = vpop.f32.mrb[8].mxu1 }
 0x380   :  { %v837_v40 = vrot.slane %v757_v60, 4  ;;  %v759_v46 = vpop.f32.mrb[9].mxu0  ;;  %v830_v47 = vpop.f32.mrb[9].mxu1  ;;  %v839_v57 = vrot.slane %v828_v39, 4  ;;  %v863_v60 = vrot.slane %v3015_v28, 6 }
 0x381   :  { %v838_v52 = vrot.slane %v759_v46, 4  ;;  %v840_v20 = vrot.slane %v830_v47, 4 }
 0x382   :  { %v845_v55 = vadd.f32 %v837_v40, %v2953_v50  ;;  %v847_v15 = vadd.f32 %v839_v57, %v2955_v51 }
 0x383   :  { %v846_v5 = vadd.f32 %v838_v52, %v2957_v56  ;;  %v848_v23 = vadd.f32 %v840_v20, %v2959_v43 }
 0x384   :  { %v849_v6 = vmul.f32 0.5, %v845_v55 }
 0x385   :  { %v853_v12 = vmul.f32 0.5, %v846_v5  ;;  %v858_v24 = vmul.f32 0.5, %v848_v23 }
 0x386   :  { %2661 = vtanh.f32 %v849_v6 }
 0x387   :  { %2663 = vtanh.f32 %v853_v12 }
 0x388   :  { %2665 = vtanh.f32 %v847_v15 }
 0x389   :  { %2667 = vtanh.f32 %v858_v24 }
 0x390   :  { %v2662_v27 = vpop.eup %2661 }
 0x391   :  { %v2664_v31 = vpop.eup %2663  ;;  %v851_v32 = vmul.f32 0.5, %v2662_v27 }
 0x392   :  { %v855_v35 = vmul.f32 0.5, %v2664_v31  ;;  %v2666_v37 = vpop.eup %2665 }
 0x393   :  { %v852_v36 = vadd.f32 0.5, %v851_v32  ;;  %v2668_v47 = vpop.eup %2667 }
 0x394   :  { %v856_v38 = vadd.f32 0.5, %v855_v35  ;;  %v860_v52 = vmul.f32 0.5, %v2668_v47 }
 0x395   :  { %v866_v39 = vmul.f32 %v2666_v37, %v852_v36 }
 0x396   :  { %v865_v40 = vmul.f32 %v863_v60, %v856_v38  ;;  %v861_v55 = vadd.f32 0.5, %v860_v52 }
 0x398   :  { %v3057_v46 = vadd.f32 %v866_v39, %v865_v40 }
 0x39a   :  { %2669 = vtanh.f32 %v3057_v46 }
 0x3a4   :  { %v2670_v57 = vpop.eup %2669 }
 0x3a5   :  { %v869_v5 = vmul.f32 %v2670_v57, %v861_v55 }
 0x3a7   :  { %v871_v6 = vrot.slane %v869_v5, 4 }
 0x3a9   :  { %938 = vmatmul.mubr.f32.vlgmr.msra.gmra.mrb[10].mxu0 %v871_v6  ;;  %1009 = vmatmul.mubr.f32.vlgmr.msra.gmra.mrb[10].mxu1 %v871_v6 }
 0x3aa   :  { %2348 = vmatpush1.bf16.msra.mxu0 %v2820_v53  ;;  %2380 = vmatpush1.bf16.msra.mxu1 %v2822_v54 }
 0x3ab   :  { %2350 = vmatprep.subr.bf16.mxu0 %v2824_v61  ;;  %2382 = vmatprep.subr.bf16.mxu1 %v2826_v62 }
 0x3ac   :  { %1119 = vmatprep.mubr.f32.mxu0 %v2773_v7  ;;  %1190 = vmatprep.mubr.f32.mxu1 %v2773_v7 }
 0x3ae   :  { %2352 = vmatpush1.bf16.msra.mxu0 %v2830_v3  ;;  %2384 = vmatpush1.bf16.msra.mxu1 %v2832_v4 }
 0x3af   :  { %2354 = vmatprep.subr.bf16.mxu0 %v2836_v9  ;;  %2386 = vmatprep.subr.bf16.mxu1 %v2838_v10 }
 0x3b2   :  { %2356 = vmatpush1.bf16.msra.mxu0 %v2844_v17  ;;  %2388 = vmatpush1.bf16.msra.mxu1 %v2846_v18 }
 0x3b3   :  { %2358 = vmatprep.subr.bf16.mxu0 %v2850_v21  ;;  %2390 = vmatprep.subr.bf16.mxu1 %v2852_v22 }
 0x3b6   :  { %2360 = vmatpush1.bf16.msra.mxu0 %v2858_v29  ;;  %2392 = vmatpush1.bf16.msra.mxu1 %v2860_v30 }
 0x3b7   :  { %2362 = vmatprep.subr.bf16.mxu0 %v2864_v33  ;;  %2394 = vmatprep.subr.bf16.mxu1 %v2866_v34 }
 0x3ba   :  { %2364 = vmatpush1.bf16.msra.mxu0 %v2870_v44  ;;  %2396 = vmatpush1.bf16.msra.mxu1 %v2872_v45 }
 0x3bb   :  { %2366 = vmatprep.subr.bf16.mxu0 %v2876_v48  ;;  %2398 = vmatprep.subr.bf16.mxu1 %v2878_v49 }
 0x3be   :  { %2368 = vmatpush1.bf16.msra.mxu0 %v2882_v58  ;;  %2400 = vmatpush1.bf16.msra.mxu1 %v2884_v59 }
 0x3bf   :  { %2370 = vmatprep.subr.bf16.mxu0 %v2888_v0  ;;  %2402 = vmatprep.subr.bf16.mxu1 %v2890_v1 }
 0x3c2   :  { %2372 = vmatpush1.bf16.msra.mxu0 %v2894_v13  ;;  %2404 = vmatpush1.bf16.msra.mxu1 %v2896_v14 }
 0x3c3   :  { %2374 = vmatprep.subr.bf16.mxu0 %v2900_v16  ;;  %2406 = vmatprep.subr.bf16.mxu1 %v2902_v19 }
 0x3c6   :  { %2376 = vmatpush1.bf16.msra.mxu0 %v2906_v25  ;;  %2408 = vmatpush1.bf16.msra.mxu1 %v2908_v26 }
 0x3c7   :  { %2410 = vmatprep.subr.bf16.mxu0 %v2813_v41  ;;  %2442 = vmatprep.subr.bf16.mxu1 %v2815_v42 }
 0x47c   :  { %v939_v28 = vpop.f32.mrb[10].mxu0  ;;  %v1010_v12 = vpop.f32.mrb[10].mxu1 }
 0x47d   :  { %v1019_v15 = vrot.slane %v939_v28, 2  ;;  %v941_v20 = vpop.f32.mrb[11].mxu0  ;;  %v1012_v23 = vpop.f32.mrb[11].mxu1  ;;  %v1021_v31 = vrot.slane %v1010_v12, 2 }
 0x47e   :  { %v1020_v24 = vrot.slane %v941_v20, 2  ;;  %v1022_v38 = vrot.slane %v1012_v23, 2 }
 0x47f   :  { %v1027_v27 = vadd.f32 %v1019_v15, %v2953_v50  ;;  %v1029_v37 = vadd.f32 %v1021_v31, %v2955_v51 }
 0x480   :  { %v1028_v32 = vadd.f32 %v1020_v24, %v2957_v56  ;;  %v1030_v60 = vadd.f32 %v1022_v38, %v2959_v43  ;;  %v1045_v56 = vrot.slane %v3057_v46, 6 }
 0x481   :  { %v1031_v35 = vmul.f32 0.5, %v1027_v27 }
 0x482   :  { %v1035_v36 = vmul.f32 0.5, %v1028_v32  ;;  %v1040_v39 = vmul.f32 0.5, %v1030_v60 }
 0x483   :  { %2671 = vtanh.f32 %v1031_v35 }
 0x484   :  { %2673 = vtanh.f32 %v1035_v36 }
 0x485   :  { %2675 = vtanh.f32 %v1029_v37 }
 0x486   :  { %2677 = vtanh.f32 %v1040_v39 }
 0x48d   :  { %v2672_v40 = vpop.eup %2671 }
 0x48e   :  { %v2674_v47 = vpop.eup %2673  ;;  %v1033_v52 = vmul.f32 0.5, %v2672_v40 }
 0x48f   :  { %v1037_v55 = vmul.f32 0.5, %v2674_v47  ;;  %v2676_v57 = vpop.eup %2675 }
 0x490   :  { %v1034_v50 = vadd.f32 0.5, %v1033_v52  ;;  %v2678_v51 = vpop.eup %2677 }
 0x491   :  { %v1038_v5 = vadd.f32 0.5, %v1037_v55  ;;  %v1042_v15 = vmul.f32 0.5, %v2678_v51 }
 0x492   :  { %v1048_v6 = vmul.f32 %v2676_v57, %v1034_v50 }
 0x493   :  { %v1047_v28 = vmul.f32 %v1045_v56, %v1038_v5  ;;  %v1043_v43 = vadd.f32 0.5, %v1042_v15 }
 0x495   :  { %v3099_v12 = vadd.f32 %v1048_v6, %v1047_v28 }
 0x497   :  { %2679 = vtanh.f32 %v3099_v12  ;;  %v1215_v6 = vrot.slane %v3099_v12, 6 }
 0x4a1   :  { %v2680_v20 = vpop.eup %2679 }
 0x4a2   :  { %v1051_v23 = vmul.f32 %v2680_v20, %v1043_v43 }
 0x4a4   :  { %v1053_v24 = vrot.slane %v1051_v23, 6 }
 0x4a6   :  { %1120 = vmatmul.mubr.f32.vlgmr.msra.gmra.mrb[12].mxu0 %v1053_v24  ;;  %1191 = vmatmul.mubr.f32.vlgmr.msra.gmra.mrb[12].mxu1 %v1053_v24 }
 0x4a7   :  { %2412 = vmatpush1.bf16.msra.mxu0 %v2820_v53  ;;  %2444 = vmatpush1.bf16.msra.mxu1 %v2822_v54 }
 0x4a8   :  { %2414 = vmatprep.subr.bf16.mxu0 %v2824_v61  ;;  %2446 = vmatprep.subr.bf16.mxu1 %v2826_v62 }
 0x4a9   :  { %1286 = vmatprep.mubr.f32.mxu0 %v2773_v7  ;;  %1357 = vmatprep.mubr.f32.mxu1 %v2773_v7 }
 0x4ab   :  { %2416 = vmatpush1.bf16.msra.mxu0 %v2830_v3  ;;  %2448 = vmatpush1.bf16.msra.mxu1 %v2832_v4 }
 0x4ac   :  { %2418 = vmatprep.subr.bf16.mxu0 %v2836_v9  ;;  %2450 = vmatprep.subr.bf16.mxu1 %v2838_v10 }
 0x4af   :  { %2420 = vmatpush1.bf16.msra.mxu0 %v2844_v17  ;;  %2452 = vmatpush1.bf16.msra.mxu1 %v2846_v18 }
 0x4b0   :  { %2422 = vmatprep.subr.bf16.mxu0 %v2850_v21  ;;  %2454 = vmatprep.subr.bf16.mxu1 %v2852_v22 }
 0x4b3   :  { %2424 = vmatpush1.bf16.msra.mxu0 %v2858_v29  ;;  %2456 = vmatpush1.bf16.msra.mxu1 %v2860_v30 }
 0x4b4   :  { %2426 = vmatprep.subr.bf16.mxu0 %v2864_v33  ;;  %2458 = vmatprep.subr.bf16.mxu1 %v2866_v34 }
 0x4b7   :  { %2428 = vmatpush1.bf16.msra.mxu0 %v2870_v44  ;;  %2460 = vmatpush1.bf16.msra.mxu1 %v2872_v45 }
 0x4b8   :  { %2430 = vmatprep.subr.bf16.mxu0 %v2876_v48  ;;  %2462 = vmatprep.subr.bf16.mxu1 %v2878_v49 }
 0x4bb   :  { %2432 = vmatpush1.bf16.msra.mxu0 %v2882_v58  ;;  %2464 = vmatpush1.bf16.msra.mxu1 %v2884_v59 }
 0x4bc   :  { %2434 = vmatprep.subr.bf16.mxu0 %v2888_v0  ;;  %2466 = vmatprep.subr.bf16.mxu1 %v2890_v1 }
 0x4bf   :  { %2436 = vmatpush1.bf16.msra.mxu0 %v2894_v13  ;;  %2468 = vmatpush1.bf16.msra.mxu1 %v2896_v14 }
 0x4c0   :  { %2438 = vmatprep.subr.bf16.mxu0 %v2900_v16  ;;  %2470 = vmatprep.subr.bf16.mxu1 %v2902_v19 }
 0x4c3   :  { %2440 = vmatpush1.bf16.msra.mxu0 %v2906_v25  ;;  %2472 = vmatpush1.bf16.msra.mxu1 %v2908_v26 }
 0x4c4   :  { %2474 = vmatprep.subr.bf16.mxu0 %v2813_v41  ;;  %2506 = vmatprep.subr.bf16.mxu1 %v2815_v42 }
 0x579   :  { %v1121_v46 = vpop.f32.mrb[12].mxu0  ;;  %v1192_v27 = vpop.f32.mrb[12].mxu1 }
 0x57a   :  { %v1197_v31 = vadd.f32 %v1121_v46, %v2961_v63  ;;  %v1123_v32 = vpop.f32.mrb[13].mxu0  ;;  %v1194_v35 = vpop.f32.mrb[13].mxu1  ;;  %v1199_v60 = vadd.f32 %v1192_v27, %v2963_v2 }
 0x57b   :  { %v1198_v36 = vadd.f32 %v1123_v32, %v2965_v8  ;;  %v1200_v39 = vadd.f32 %v1194_v35, %v2967_v11 }
 0x57c   :  { %v1201_v37 = vmul.f32 0.5, %v1197_v31 }
 0x57d   :  { %v1205_v38 = vmul.f32 0.5, %v1198_v36  ;;  %v1210_v40 = vmul.f32 0.5, %v1200_v39 }
 0x57e   :  { %2681 = vtanh.f32 %v1201_v37 }
 0x57f   :  { %2683 = vtanh.f32 %v1205_v38 }
 0x580   :  { %2685 = vtanh.f32 %v1199_v60 }
 0x581   :  { %2687 = vtanh.f32 %v1210_v40 }
 0x588   :  { %v2682_v47 = vpop.eup %2681 }
 0x589   :  { %v2684_v52 = vpop.eup %2683  ;;  %v1203_v55 = vmul.f32 0.5, %v2682_v47 }
 0x58a   :  { %v1207_v50 = vmul.f32 0.5, %v2684_v52  ;;  %v2686_v5 = vpop.eup %2685 }
 0x58b   :  { %v1204_v57 = vadd.f32 0.5, %v1203_v55  ;;  %v2688_v43 = vpop.eup %2687 }
 0x58c   :  { %v1208_v56 = vadd.f32 0.5, %v1207_v50  ;;  %v1212_v20 = vmul.f32 0.5, %v2688_v43 }
 0x58d   :  { %v1218_v28 = vmul.f32 %v2686_v5, %v1204_v57 }
 0x58e   :  { %v1217_v51 = vmul.f32 %v1215_v6, %v1208_v56  ;;  %v1213_v23 = vadd.f32 0.5, %v1212_v20 }
 0x590   :  { %v3141_v15 = vadd.f32 %v1218_v28, %v1217_v51 }
 0x592   :  { %2689 = vtanh.f32 %v3141_v15  ;;  %v1394_v51 = vrot.slane %v3141_v15, 6 }
 0x59c   :  { %v2690_v24 = vpop.eup %2689 }
 0x59d   :  { %v1221_v46 = vmul.f32 %v2690_v24, %v1213_v23 }
 0x59f   :  { %1287 = vmatmul.mubr.f32.vlgmr.msra.gmra.mrb[14].mxu0 %v1221_v46  ;;  %1358 = vmatmul.mubr.f32.vlgmr.msra.gmra.mrb[14].mxu1 %v1221_v46 }
 0x5a0   :  { %2476 = vmatpush1.bf16.msra.mxu0 %v2820_v53  ;;  %2508 = vmatpush1.bf16.msra.mxu1 %v2822_v54 }
 0x5a1   :  { %2478 = vmatprep.subr.bf16.mxu0 %v2824_v61  ;;  %2510 = vmatprep.subr.bf16.mxu1 %v2826_v62 }
 0x5a2   :  { %1468 = vmatprep.mubr.f32.mxu0 %v2773_v7  ;;  %1539 = vmatprep.mubr.f32.mxu1 %v2773_v7 }
 0x5a4   :  { %2480 = vmatpush1.bf16.msra.mxu0 %v2830_v3  ;;  %2512 = vmatpush1.bf16.msra.mxu1 %v2832_v4 }
 0x5a5   :  { %2482 = vmatprep.subr.bf16.mxu0 %v2836_v9  ;;  %2514 = vmatprep.subr.bf16.mxu1 %v2838_v10 }
 0x5a8   :  { %2484 = vmatpush1.bf16.msra.mxu0 %v2844_v17  ;;  %2516 = vmatpush1.bf16.msra.mxu1 %v2846_v18 }
 0x5a9   :  { %2486 = vmatprep.subr.bf16.mxu0 %v2850_v21  ;;  %2518 = vmatprep.subr.bf16.mxu1 %v2852_v22 }
 0x5ac   :  { %2488 = vmatpush1.bf16.msra.mxu0 %v2858_v29  ;;  %2520 = vmatpush1.bf16.msra.mxu1 %v2860_v30 }
 0x5ad   :  { %2490 = vmatprep.subr.bf16.mxu0 %v2864_v33  ;;  %2522 = vmatprep.subr.bf16.mxu1 %v2866_v34 }
 0x5b0   :  { %2492 = vmatpush1.bf16.msra.mxu0 %v2870_v44  ;;  %2524 = vmatpush1.bf16.msra.mxu1 %v2872_v45 }
 0x5b1   :  { %2494 = vmatprep.subr.bf16.mxu0 %v2876_v48  ;;  %2526 = vmatprep.subr.bf16.mxu1 %v2878_v49 }
 0x5b4   :  { %2496 = vmatpush1.bf16.msra.mxu0 %v2882_v58  ;;  %2528 = vmatpush1.bf16.msra.mxu1 %v2884_v59 }
 0x5b5   :  { %2498 = vmatprep.subr.bf16.mxu0 %v2888_v0  ;;  %2530 = vmatprep.subr.bf16.mxu1 %v2890_v1 }
 0x5b8   :  { %2500 = vmatpush1.bf16.msra.mxu0 %v2894_v13  ;;  %2532 = vmatpush1.bf16.msra.mxu1 %v2896_v14 }
 0x5b9   :  { %2502 = vmatprep.subr.bf16.mxu0 %v2900_v16  ;;  %2534 = vmatprep.subr.bf16.mxu1 %v2902_v19 }
 0x5bc   :  { %2504 = vmatpush1.bf16.msra.mxu0 %v2906_v25  ;;  %2536 = vmatpush1.bf16.msra.mxu1 %v2908_v26 }
 0x5bd   :  { %2538 = vmatprep.subr.bf16.mxu0 %v2813_v41  ;;  %2570 = vmatprep.subr.bf16.mxu1 %v2815_v42 }
 0x672   :  { %v1288_v12 = vpop.f32.mrb[14].mxu0  ;;  %v1359_v27 = vpop.f32.mrb[14].mxu1 }
 0x673   :  { %v1368_v31 = vrot.slane %v1288_v12, 6  ;;  %v1290_v32 = vpop.f32.mrb[15].mxu0  ;;  %v1361_v35 = vpop.f32.mrb[15].mxu1  ;;  %v1370_v38 = vrot.slane %v1359_v27, 6 }
 0x674   :  { %v1369_v36 = vrot.slane %v1290_v32, 6  ;;  %v1371_v52 = vrot.slane %v1361_v35, 6 }
 0x675   :  { %v1376_v37 = vadd.f32 %v1368_v31, %v2961_v63  ;;  %v1378_v47 = vadd.f32 %v1370_v38, %v2963_v2 }
 0x676   :  { %v1377_v60 = vadd.f32 %v1369_v36, %v2965_v8  ;;  %v1379_v41 = vadd.f32 %v1371_v52, %v2967_v11  ;;  %v1765_v36 = vld [vmem:[#allocation2 + $0x460] sm:$0xff] }
 0x677   :  { %v1380_v39 = vmul.f32 0.5, %v1376_v37  ;;  %v1766_v37 = vld [vmem:[#allocation2 + $0x480] sm:$0xff] }
 0x678   :  { %v1384_v40 = vmul.f32 0.5, %v1377_v60  ;;  %v1389_v42 = vmul.f32 0.5, %v1379_v41  ;;  %v2602_v38 = vpack.c.bf16 %v1766_v37, %v1765_v36  ;;  %v2775_v60 = vmov 0.0|0.0   ;;  %v1769_v52 = vld [vmem:[#allocation2 + $0x4e0] sm:$0xff] }
 0x679   :  { %2691 = vtanh.f32 %v1380_v39  ;;  %v1767_v39 = vld [vmem:[#allocation2 + $0x4a0] sm:$0xff] }
 0x67a   :  { %2693 = vtanh.f32 %v1384_v40  ;;  %v1768_v40 = vld [vmem:[#allocation2 + $0x4c0] sm:$0xff] }
 0x67b   :  { %2695 = vtanh.f32 %v1378_v47  ;;  %v2605_v47 = vpack.c.bf16 %v1768_v40, %v1767_v39  ;;  %v1770_v41 = vld [vmem:[#allocation2 + $0x500] sm:$0xff] }
 0x67c   :  { %2697 = vtanh.f32 %v1389_v42  ;;  %v2608_v42 = vpack.c.bf16 %v1770_v41, %v1769_v52  ;;  %v1781_v36 = vld [vmem:[#allocation2 + $0x420] ss:$0 sm:$0xff] }
 0x67d   :  { %v1786_v39 = vld [vmem:[#allocation2 + $0x440] ss:$0 sm:$0xff] }
 0x683   :  { %v2692_v55 = vpop.eup %2691 }
 0x684   :  { %v2694_v50 = vpop.eup %2693  ;;  %v1382_v57 = vmul.f32 0.5, %v2692_v55  ;;  %v1771_v55 = vld [vmem:[#allocation2 + $0x520] sm:$0xff] }
 0x685   :  { %v1386_v5 = vmul.f32 0.5, %v2694_v50  ;;  %v2696_v6 = vpop.eup %2695  ;;  %v1772_v50 = vld [vmem:[#allocation2 + $0x540] sm:$0xff] }
 0x686   :  { %v1383_v56 = vadd.f32 0.5, %v1382_v57  ;;  %v2698_v24 = vpop.eup %2697  ;;  %v2611_v57 = vpack.c.bf16 %v1772_v50, %v1771_v55 }
 0x687   :  { %v1387_v28 = vadd.f32 0.5, %v1386_v5  ;;  %v1391_v46 = vmul.f32 0.5, %v2698_v24  ;;  %v1773_v5 = vld [vmem:[#allocation2 + $0x560] sm:$0xff] }
 0x688   :  { %v1397_v43 = vmul.f32 %v2696_v6, %v1383_v56  ;;  %v1774_v56 = vld [vmem:[#allocation2 + $0x580] sm:$0xff] }
 0x689   :  { %v1396_v20 = vmul.f32 %v1394_v51, %v1387_v28  ;;  %v1392_v12 = vadd.f32 0.5, %v1391_v46  ;;  %v2614_v6 = vpack.c.bf16 %v1774_v56, %v1773_v5  ;;  %v1775_v28 = vld [vmem:[#allocation2 + $0x5a0] sm:$0xff] }
 0x68a   :  { %v1776_v51 = vld [vmem:[#allocation2 + $0x5c0] sm:$0xff] }
 0x68b   :  { %v3183_v23 = vadd.f32 %v1397_v43, %v1396_v20  ;;  %v2617_v43 = vpack.c.bf16 %v1776_v51, %v1775_v28  ;;  %v1777_v20 = vld [vmem:[#allocation2 + $0x5e0] sm:$0xff] }
 0x68c   :  { %v1779_v46 = vld [vmem:[#allocation2 + $0x620] sm:$0xff] }
 0x68d   :  { %2699 = vtanh.f32 %v3183_v23 }
 0x697   :  { %v2700_v27 = vpop.eup %2699 }
 0x698   :  { %v1400_v31 = vmul.f32 %v2700_v27, %v1392_v12  ;;  %v1780_v12 = vld [vmem:[#allocation2 + $0x640] sm:$0xff] }
 0x699   :  { %v2623_v27 = vpack.c.bf16 %v1780_v12, %v1779_v46 }
 0x69a   :  { %v1402_v32 = vrot.slane %v1400_v31, 2  ;;  %v1782_v31 = vld [vmem:[#allocation2 + $0x660] sm:$0xff] }
 0x69c   :  { %1469 = vmatmul.mubr.f32.vlgmr.msra.gmra.mrb[16].mxu0 %v1402_v32  ;;  %1540 = vmatmul.mubr.f32.vlgmr.msra.gmra.mrb[16].mxu1 %v1402_v32  ;;  %v1783_v32 = vld [vmem:[#allocation2 + $0x680] sm:$0xff] }
 0x69d   :  { %2540 = vmatpush1.bf16.msra.mxu0 %v2820_v53  ;;  %2572 = vmatpush1.bf16.msra.mxu1 %v2822_v54 }
 0x69e   :  { %2542 = vmatprep.subr.bf16.mxu0 %v2824_v61  ;;  %2574 = vmatprep.subr.bf16.mxu1 %v2826_v62 }
 0x69f   :  { %1650 = vmatprep.mubr.f32.mxu0 %v2773_v7  ;;  %1721 = vmatprep.mubr.f32.mxu1 %v2773_v7 }
 0x6a1   :  { %2544 = vmatpush1.bf16.msra.mxu0 %v2830_v3  ;;  %2576 = vmatpush1.bf16.msra.mxu1 %v2832_v4 }
 0x6a2   :  { %2546 = vmatprep.subr.bf16.mxu0 %v2836_v9  ;;  %2578 = vmatprep.subr.bf16.mxu1 %v2838_v10 }
 0x6a5   :  { %2548 = vmatpush1.bf16.msra.mxu0 %v2844_v17  ;;  %2580 = vmatpush1.bf16.msra.mxu1 %v2846_v18 }
 0x6a6   :  { %2550 = vmatprep.subr.bf16.mxu0 %v2850_v21  ;;  %2582 = vmatprep.subr.bf16.mxu1 %v2852_v22 }
 0x6a9   :  { %2552 = vmatpush1.bf16.msra.mxu0 %v2858_v29  ;;  %2584 = vmatpush1.bf16.msra.mxu1 %v2860_v30 }
 0x6aa   :  { %2554 = vmatprep.subr.bf16.mxu0 %v2864_v33  ;;  %2586 = vmatprep.subr.bf16.mxu1 %v2866_v34 }
 0x6ad   :  { %2556 = vmatpush1.bf16.msra.mxu0 %v2870_v44  ;;  %2588 = vmatpush1.bf16.msra.mxu1 %v2872_v45 }
 0x6ae   :  { %2558 = vmatprep.subr.bf16.mxu0 %v2876_v48  ;;  %2590 = vmatprep.subr.bf16.mxu1 %v2878_v49 }
 0x6b1   :  { %2560 = vmatpush1.bf16.msra.mxu0 %v2882_v58  ;;  %2592 = vmatpush1.bf16.msra.mxu1 %v2884_v59 }
 0x6b2   :  { %2562 = vmatprep.subr.bf16.mxu0 %v2888_v0  ;;  %2594 = vmatprep.subr.bf16.mxu1 %v2890_v1  ;;  %v1576_v0 = vrot.slane %v3183_v23, 6  ;;  %v1778_v23 = vld [vmem:[#allocation2 + $0x600] sm:$0xff] }
 0x6b3   :  { %v2620_v24 = vpack.c.bf16 %v1778_v23, %v1777_v20 }
 0x6b5   :  { %2564 = vmatpush1.bf16.msra.mxu0 %v2894_v13  ;;  %2596 = vmatpush1.bf16.msra.mxu1 %v2896_v14 }
 0x6b6   :  { %2566 = vmatprep.subr.bf16.mxu0 %v2900_v16  ;;  %2598 = vmatprep.subr.bf16.mxu1 %v2902_v19 }
 0x6b9   :  { %2568 = vmatpush1.bf16.msra.mxu0 %v2906_v25  ;;  %2600 = vmatpush1.bf16.msra.mxu1 %v2908_v26 }
 0x6ba   :  { %2601 = vmatprep.subr.bf16.mxu0 %v2775_v60  ;;  %2625 = vmatprep.subr.bf16.mxu1 %v2775_v60 }
 0x76f   :  { %v1470_v53 = vpop.f32.mrb[16].mxu0  ;;  %v1541_v54 = vpop.f32.mrb[16].mxu1 }
 0x770   :  { %v1550_v61 = vrot.slane %v1470_v53, 4  ;;  %v1472_v62 = vpop.f32.mrb[17].mxu0  ;;  %v1543_v3 = vpop.f32.mrb[17].mxu1  ;;  %v1552_v10 = vrot.slane %v1541_v54, 4  ;;  %v2626_v53 = vpack.c.bf16 %v1783_v32, %v1782_v31 }
 0x771   :  { %v1551_v4 = vrot.slane %v1472_v62, 4  ;;  %v1553_v29 = vrot.slane %v1543_v3, 4 }
 0x772   :  { %v1558_v9 = vadd.f32 %v1550_v61, %v2961_v63  ;;  %v1560_v22 = vadd.f32 %v1552_v10, %v2963_v2 }
 0x773   :  { %v1559_v17 = vadd.f32 %v1551_v4, %v2965_v8  ;;  %v1561_v30 = vadd.f32 %v1553_v29, %v2967_v11 }
 0x774   :  { %v1562_v18 = vmul.f32 0.5, %v1558_v9 }
 0x775   :  { %v1566_v21 = vmul.f32 0.5, %v1559_v17  ;;  %v1571_v33 = vmul.f32 0.5, %v1561_v30 }
 0x776   :  { %2701 = vtanh.f32 %v1562_v18 }
 0x777   :  { %2703 = vtanh.f32 %v1566_v21 }
 0x778   :  { %2705 = vtanh.f32 %v1560_v22 }
 0x779   :  { %2707 = vtanh.f32 %v1571_v33 }
 0x780   :  { %v2702_v34 = vpop.eup %2701 }
 0x781   :  { %v2704_v44 = vpop.eup %2703  ;;  %v1564_v45 = vmul.f32 0.5, %v2702_v34 }
 0x782   :  { %v1568_v48 = vmul.f32 0.5, %v2704_v44  ;;  %v2706_v58 = vpop.eup %2705 }
 0x783   :  { %v1565_v49 = vadd.f32 0.5, %v1564_v45  ;;  %v2708_v16 = vpop.eup %2707 }
 0x784   :  { %v1569_v59 = vadd.f32 0.5, %v1568_v48  ;;  %v1573_v19 = vmul.f32 0.5, %v2708_v16 }
 0x785   :  { %v1579_v1 = vmul.f32 %v2706_v58, %v1565_v49 }
 0x786   :  { %v1578_v13 = vmul.f32 %v1576_v0, %v1569_v59  ;;  %v1574_v25 = vadd.f32 0.5, %v1573_v19 }
 0x788   :  { %v3223_v14 = vadd.f32 %v1579_v1, %v1578_v13 }
 0x78a   :  { %2709 = vtanh.f32 %v3223_v14 }
 0x794   :  { %v2710_v26 = vpop.eup %2709 }
 0x795   :  { %v1582_v15 = vmul.f32 %v2710_v26, %v1574_v25  ;;  %v1784_v26 = vld [vmem:[#allocation2 + $0x6a0] sm:$0xff] }
 0x797   :  { %v1584_v35 = vrot.slane %v1582_v15, 4  ;;  %v1785_v15 = vld [vmem:[#allocation2 + $0x6c0] sm:$0xff] }
 0x799   :  { %1651 = vmatmul.mubr.f32.vlgmr.msra.gmra.mrb[18].mxu0 %v1584_v35  ;;  %1722 = vmatmul.mubr.f32.vlgmr.msra.gmra.mrb[18].mxu1 %v1584_v35  ;;  %v2629_v35 = vpack.c.bf16 %v1785_v15, %v1784_v26 }
 0x79a   :  { %2603 = vmatpush3.bf16.msra.mxu0 %v2602_v38  ;;  %2011 = vmatprep.mubr.msk.f32.mxu0 %vm2776_vm2, %v2773_v7 }
 0x79b   :  { %2604 = vmatprep.subr.bf16.mxu0 %v2775_v60  ;;  %2022 = vmatprep.mubr.msk.f32.mxu1 %vm2776_vm2, %v2773_v7 }
 0x79c   :  { %2627 = vmatpush3.bf16.msra.mxu1 %v2626_v53 }
 0x79d   :  { %2628 = vmatprep.subr.bf16.mxu1 %v2775_v60 }
 0x79e   :  { %2606 = vmatpush3.bf16.msra.mxu0 %v2605_v47 }
 0x79f   :  { %2607 = vmatprep.subr.bf16.mxu0 %v2775_v60 }
 0x7a0   :  { %2630 = vmatpush3.bf16.msra.mxu1 %v2629_v35 }
 0x7a2   :  { %2609 = vmatpush3.bf16.msra.mxu0 %v2608_v42 }
 0x7a3   :  { %2610 = vmatprep.subr.bf16.mxu0 %v2775_v60 }
 0x7a6   :  { %2612 = vmatpush3.bf16.msra.mxu0 %v2611_v57 }
 0x7a7   :  { %2613 = vmatprep.subr.bf16.mxu0 %v2775_v60 }
 0x7aa   :  { %2615 = vmatpush3.bf16.msra.mxu0 %v2614_v6 }
 0x7ab   :  { %2616 = vmatprep.subr.bf16.mxu0 %v2775_v60 }
 0x7ae   :  { %2618 = vmatpush3.bf16.msra.mxu0 %v2617_v43 }
 0x7af   :  { %2619 = vmatprep.subr.bf16.mxu0 %v2775_v60 }
 0x7b2   :  { %2621 = vmatpush3.bf16.msra.mxu0 %v2620_v24 }
 0x7b3   :  { %2622 = vmatprep.subr.bf16.mxu0 %v2775_v60 }
 0x7b6   :  { %2624 = vmatpush3.bf16.msra.mxu0 %v2623_v27 }
 0x86c   :  { %v1652_v54 = vpop.f32.mrb[18].mxu0  ;;  %v1723_v61 = vpop.f32.mrb[18].mxu1 }
 0x86d   :  { %v1732_v62 = vrot.slane %v1652_v54, 2  ;;  %v1654_v3 = vpop.f32.mrb[19].mxu0  ;;  %v1725_v4 = vpop.f32.mrb[19].mxu1  ;;  %v1734_v10 = vrot.slane %v1723_v61, 2 }
 0x86e   :  { %v1733_v7 = vrot.slane %v1654_v3, 2  ;;  %v1735_v29 = vrot.slane %v1725_v4, 2 }
 0x86f   :  { %v1740_v9 = vadd.f32 %v1732_v62, %v2961_v63  ;;  %v1742_v22 = vadd.f32 %v1734_v10, %v2963_v2 }
 0x870   :  { %v1741_v17 = vadd.f32 %v1733_v7, %v2965_v8  ;;  %v1743_v30 = vadd.f32 %v1735_v29, %v2967_v11  ;;  %v1758_v8 = vrot.slane %v3223_v14, 6 }
 0x871   :  { %v1744_v18 = vmul.f32 0.5, %v1740_v9 }
 0x872   :  { %v1748_v21 = vmul.f32 0.5, %v1741_v17  ;;  %v1753_v33 = vmul.f32 0.5, %v1743_v30 }
 0x873   :  { %2711 = vtanh.f32 %v1744_v18 }
 0x874   :  { %2713 = vtanh.f32 %v1748_v21 }
 0x875   :  { %2715 = vtanh.f32 %v1742_v22 }
 0x876   :  { %2717 = vtanh.f32 %v1753_v33 }
 0x87d   :  { %v2712_v34 = vpop.eup %2711 }
 0x87e   :  { %v2714_v44 = vpop.eup %2713  ;;  %v1746_v45 = vmul.f32 0.5, %v2712_v34 }
 0x87f   :  { %v1750_v48 = vmul.f32 0.5, %v2714_v44  ;;  %v2716_v49 = vpop.eup %2715 }
 0x880   :  { %v1747_v63 = vadd.f32 0.5, %v1746_v45  ;;  %v2718_v2 = vpop.eup %2717 }
 0x881   :  { %v1751_v58 = vadd.f32 0.5, %v1750_v48  ;;  %v1755_v13 = vmul.f32 0.5, %v2718_v2 }
 0x882   :  { %v1761_v59 = vmul.f32 %v2716_v49, %v1747_v63 }
 0x883   :  { %v1760_v0 = vmul.f32 %v1758_v8, %v1751_v58  ;;  %v1756_v16 = vadd.f32 0.5, %v1755_v13 }
 0x885   :  { %v1762_v1 = vadd.f32 %v1761_v59, %v1760_v0 }
 0x887   :  { %2719 = vtanh.f32 %v1762_v1 }
 0x891   :  { %v2720_v19 = vpop.eup %2719 }
 0x892   :  { %v1764_v11 = vmul.f32 %v2720_v19, %v1756_v16 }
 0x894   :  { %v1788_v25 = vrot.slane %v1764_v11, 6 }
 0x896   :  { %2012 = vmatmul.mubr.f32.vlgmr.msra.gmra.mrb[20].mxu0 %v1788_v25 }
 0x969   :  { %v1856_v37 = vpop.f32.mrb[20].mxu0 }
 0x96a   :  { %v1857_v38 = vadd.f32 %v1856_v37, %v1781_v36  ;;  %v2013_v60 = vpop.f32.mrb[21].mxu0 }
 0x96c   :  { %v1860_v14 = vmax.f32 %v1857_v38, 0.0 }
 0x96e   :  { %2023 = vmatmul.mubr.msk.f32.vlgmr.msra.gmra.mrb[20].mxu1 %vm1861_vm3, %v1860_v14 }
 0xa41   :  { %v1931_v40 = vpop.f32.mrb[20].mxu1 }
 0xa42   :  { %v1932_v47 = vadd.f32 %v1931_v40, %v1786_v39  ;;  %v2024_v52 = vpop.f32.mrb[21].mxu1 }
 0xa44   :  { %1936 = vst.msk [vmem:[#allocation5] sm:$0x3] %vm1935_vm4, %v1932_v47 }
 0xa45   :  { %2754 = shalt.err (!%p2751_p12)
}
 0xa46   :  { %s2755_s30 = scalar_lea.hbm %s3247_s2, 32 }
 0xa47   :  { %p2756_p13 = scmp.ne.s32.totalorder %s3247_s2, %s2755_s30  ;;  %p2759_p0 = scmp.lt.u32.totalorder %s2755_s30, %s3247_s2 }
 0xa49   :  { %p2761_p1 = pnand %p2759_p0, %p2756_p13 }
 0xa4b   :  { %2764 = shalt.err (!%p2761_p1)
}
 0xa4c   :  { %1946 = dma.vmem_to_hbm [thread:$0]  %s1944_s1, 32, %s3247_s2, [#allocation4]  }
 0xa4d   :  { %2767 = dma.done.wait [#allocation4], 32  }
 0xa4e   :  { %2768 = vsyncadd [#allocation4], 4294967264 }
 0xa4f   :  { %1950 = vsyncpa [#allocation3], 1 }
 0xa50   :  { %1951 = vsyncpa [#allocation4], 1 }

</bundles_post_ra>
